<compile_context>
chip_gen: v7x
topology: tpu7x:2x2x1
jax: 0.10.0
libtpu: 0.0.40
codegen_flags: <defaults>
</compile_context>

<pallas_src>
import jax
import jax.numpy as jnp
from jax.experimental import pallas as pl
from jax.experimental.pallas import tpu as pltpu

HIDDEN = 256          # MLPenc / FC_Classifier hidden_dim
NUM_CLASSES = 8
NUM_DOMAINS = 2
BN_EPS = 1e-5
HEAD_PAD = 128        # lane-dense padded width for the fused head output


def _round_up(x, m):
    return (x + m - 1) // m * m


# --------------------------------------------------------------------------
# kernel
# --------------------------------------------------------------------------
def mlpdann_kernel(x_ref,
                   w1_ref, b1_ref,
                   w2_ref, b2_ref,
                   w3_ref, b3_ref,
                   wd1_ref, bd1_ref,
                   wd2_ref, bd2_ref,
                   wh_ref, bh_ref,
                   out_ref):
    """One (TILE_B, D) batch tile of the eval-mode MLPDANN forward.

    Every Linear->BatchNorm1d(eval) pair is pre-folded into (bf16 W, f32 b);
    Dropout(eval) and grad_reverse are identity in the forward pass.  Both
    heads are one fused (512, 128) matmul over concat(out_emb, h): classifier
    logits land in output columns [0, 8), domain logits in [8, 10), zeros
    elsewhere (exact, since padded weight columns are zero).
    """

    def layer(h_bf16, w_ref, b_ref):
        # bf16 MXU inputs, f32 accumulation; bias + ReLU in f32 (v5e has no
        # bf16 VPU), then a single cast so the live activation is bf16.
        z = jnp.dot(h_bf16, w_ref[...], preferred_element_type=jnp.float32)
        return jnp.maximum(z + b_ref[...], 0.0).astype(jnp.bfloat16)

    x = x_ref[...]                                   # already bf16

    # encoder (MLPenc): layer1 -> layer2 -> layer3
    out_emb = layer(layer(layer(x, w1_ref, b1_ref), w2_ref, b2_ref),
                    w3_ref, b3_ref)

    # domain-discriminator hidden stack (grad_reverse == identity forward)
    h = layer(layer(out_emb, wd1_ref, bd1_ref), wd2_ref, bd2_ref)

    # fused heads: one K=512, N=128 matmul -> lane-dense bf16 store
    heads = jnp.dot(jnp.concatenate([out_emb, h], axis=-1), wh_ref[...],
                    preferred_element_type=jnp.float32) + bh_ref[...]
    out_ref[...] = heads.astype(out_ref.dtype)


# --------------------------------------------------------------------------
# parameter construction (PyTorch-style init, then fold / pad / cast)
# --------------------------------------------------------------------------
def _linear_params(key, fan_in, fan_out):
    """nn.Linear init: U(-1/sqrt(fan_in), 1/sqrt(fan_in)) for W and b."""
    kw, kb = jax.random.split(key)
    bound = 1.0 / jnp.sqrt(jnp.float32(fan_in))
    w = jax.random.uniform(kw, (fan_in, fan_out), jnp.float32, -bound, bound)
    b = jax.random.uniform(kb, (fan_out,), jnp.float32, -bound, bound)
    return w, b


def _bn_scale_shift(num_features):
    """Eval-mode BN with fresh stats: gamma=1, beta=0, mean=0, var=1."""
    gamma = jnp.ones((num_features,), jnp.float32)
    beta = jnp.zeros((num_features,), jnp.float32)
    mean = jnp.zeros((num_features,), jnp.float32)
    var = jnp.ones((num_features,), jnp.float32)
    scale = gamma / jnp.sqrt(var + BN_EPS)
    shift = beta - mean * scale
    return scale, shift
    # TODO(synk): re-fold with real running stats if trained weights are loaded.


def _fold(w, b, scale, shift):
    """(x @ W + b) * s + t  ==  x @ (W * s) + (b * s + t)."""
    return w * scale[None, :], b * scale + shift


def init_params(key, in_features):
    """Build folded / padded / bf16 kernel parameters."""
    d_pad = _round_up(in_features, 128)
    keys = jax.random.split(key, 7)

    # --- encoder: 3 x Linear->BN folded ---
    enc = []
    dims = [(in_features, HIDDEN), (HIDDEN, HIDDEN), (HIDDEN, HIDDEN)]
    for i, (fi, fo) in enumerate(dims):
        w, b = _linear_params(keys[i], fi, fo)
        s, t = _bn_scale_shift(fo)
        enc.append(_fold(w, b, s, t))
    w1, b1 = enc[0]
    if d_pad != in_features:                       # lane-pad flattened input dim
        w1 = jnp.pad(w1, ((0, d_pad - in_features), (0, 0)))
    enc[0] = (w1, b1)

    # --- classifier head (no hidden layers, no BN) ---
    wc, bc = _linear_params(keys[3], HIDDEN, NUM_CLASSES)

    # --- discriminator: 2 x Linear->BN folded + Linear(HIDDEN, 2) ---
    wd1, bd1 = _fold(*_linear_params(keys[4], HIDDEN, HIDDEN),
                     *_bn_scale_shift(HIDDEN))
    wd2, bd2 = _fold(*_linear_params(keys[5], HIDDEN, HIDDEN),
                     *_bn_scale_shift(HIDDEN))
    wdo, bdo = _linear_params(keys[6], HIDDEN, NUM_DOMAINS)

    # --- fused (512, 128) head weight:
    #     rows [0,256)   = out_emb -> clf   (output cols [0, 8))
    #     rows [256,512) = h       -> discr (output cols [8, 10)) ---
    wh = jnp.zeros((2 * HIDDEN, HEAD_PAD), jnp.float32)
    wh = wh.at[:HIDDEN, :NUM_CLASSES].set(wc)
    wh = wh.at[HIDDEN:, NUM_CLASSES:NUM_CLASSES + NUM_DOMAINS].set(wdo)
    bh = jnp.zeros((HEAD_PAD,), jnp.float32)
    bh = bh.at[:NUM_CLASSES].set(bc)
    bh = bh.at[NUM_CLASSES:NUM_CLASSES + NUM_DOMAINS].set(bdo)

    wcast = lambda w: w.astype(jnp.bfloat16)
    brow = lambda b: b.reshape(1, -1).astype(jnp.float32)

    return (
        wcast(enc[0][0]), brow(enc[0][1]),
        wcast(enc[1][0]), brow(enc[1][1]),
        wcast(enc[2][0]), brow(enc[2][1]),
        wcast(wd1), brow(bd1),
        wcast(wd2), brow(bd2),
        wcast(wh), brow(bh),
    )


# --------------------------------------------------------------------------
# wrapper
# --------------------------------------------------------------------------
def mlpdann_forward(x_nchw, params, tile_b=1024):
    B = x_nchw.shape[0]
    # Single-pass preamble: flatten + bf16 cast, then one combined pad.
    x_flat = x_nchw.reshape(B, -1).astype(jnp.bfloat16)      # nn.Flatten()
    D = x_flat.shape[1]
    d_pad = _round_up(D, 128)

    # Batch tile: multiple of 8 sublanes, capped so the grid has >= 2 steps
    # whenever B allows (v7x has 2 TensorCores sharing the "parallel" axis).
    tb = min(tile_b, max(8, _round_up(pl.cdiv(B, 2), 8)))
    b_pad = _round_up(B, tb)
    pad_b, pad_d = b_pad - B, d_pad - D
    if pad_b or pad_d:
        x_flat = jnp.pad(x_flat, ((0, pad_b), (0, pad_d)))

    grid = (b_pad // tb,)

    def const_spec(shape):
        return pl.BlockSpec(shape, lambda i: (0,) * len(shape))

    in_specs = [pl.BlockSpec((tb, d_pad), lambda i: (i, 0))]
    in_specs += [const_spec(p.shape) for p in params]        # weights stay resident

    fn = pl.pallas_call(
        mlpdann_kernel,
        grid=grid,
        out_shape=jax.ShapeDtypeStruct((b_pad, HEAD_PAD), jnp.bfloat16),
        in_specs=in_specs,
        out_specs=pl.BlockSpec((tb, HEAD_PAD), lambda i: (i, 0)),
        compiler_params=pltpu.CompilerParams(
            dimension_semantics=("parallel",),     # shards batch axis on v7x
            vmem_limit_bytes=32 << 20),
    )
    heads = fn(x_flat, *params)
    classif = heads[:B, :NUM_CLASSES].astype(jnp.float32)
    classif_discr = heads[:B, NUM_CLASSES:NUM_CLASSES + NUM_DOMAINS].astype(
        jnp.float32)
    return classif, classif_discr


# pure-JAX reference mirroring the kernel numerics (same folded bf16 params,
# bf16 inputs/activations, f32 accumulation) — checks the Pallas lowering.
def _reference_forward(x_nchw, params):
    (w1, b1, w2, b2, w3, b3, wd1, bd1, wd2, bd2, wh, bh) = params
    B = x_nchw.shape[0]
    x = x_nchw.reshape(B, -1).astype(jnp.bfloat16)
    D = x.shape[1]
    d_pad = w1.shape[0]
    if d_pad != D:
        x = jnp.pad(x, ((0, 0), (0, d_pad - D)))

    def layer(h, w, b):
        z = jnp.dot(h, w, preferred_element_type=jnp.float32)
        return jnp.maximum(z + b, 0.0).astype(jnp.bfloat16)

    out_emb = layer(layer(layer(x, w1, b1), w2, b2), w3, b3)
    h = layer(layer(out_emb, wd1, bd1), wd2, bd2)
    heads = jnp.dot(jnp.concatenate([out_emb, h], axis=-1), wh,
                    preferred_element_type=jnp.float32) + bh
    return (heads[:, :NUM_CLASSES],
            heads[:, NUM_CLASSES:NUM_CLASSES + NUM_DOMAINS])


if __name__ == "__main__":
    key = jax.random.PRNGKey(0)
    kx, kp = jax.random.split(key)

    # NCHW conv-style input: (batch=2, C=4, 16, 16) -> flatten to 1024 features
    B, C, H, W = 2, 4, 16, 16
    x = jax.random.normal(kx, (B, C, H, W), jnp.float32)

    params = init_params(kp, C * H * W)

    fwd = jax.jit(lambda xx: mlpdann_forward(xx, params))
    classif, classif_discr = fwd(x)
    jax.block_until_ready((classif, classif_discr))

    assert classif.shape == (B, NUM_CLASSES)
    assert classif_discr.shape == (B, NUM_DOMAINS)

    ref_c, ref_d = _reference_forward(x, params)
    assert jnp.all(jnp.isfinite(classif)) and jnp.all(jnp.isfinite(classif_discr))
    assert jnp.allclose(classif, ref_c, rtol=2e-2, atol=2e-2)
    assert jnp.allclose(classif_discr, ref_d, rtol=2e-2, atol=2e-2)

    print("KERNEL_OK")
</pallas_src>

<mosaic_0001>
module attributes {stable_mosaic.version = 11 : i64} {
  func.func @mlpdann_kernel(%arg0: i32, %arg1: memref<8x1024xbf16, #tpu.memory_space<vmem>>, %arg2: memref<1024x256xbf16, #tpu.memory_space<vmem>>, %arg3: memref<1x256xf32, #tpu.memory_space<vmem>>, %arg4: memref<256x256xbf16, #tpu.memory_space<vmem>>, %arg5: memref<1x256xf32, #tpu.memory_space<vmem>>, %arg6: memref<256x256xbf16, #tpu.memory_space<vmem>>, %arg7: memref<1x256xf32, #tpu.memory_space<vmem>>, %arg8: memref<256x256xbf16, #tpu.memory_space<vmem>>, %arg9: memref<1x256xf32, #tpu.memory_space<vmem>>, %arg10: memref<256x256xbf16, #tpu.memory_space<vmem>>, %arg11: memref<1x256xf32, #tpu.memory_space<vmem>>, %arg12: memref<512x128xbf16, #tpu.memory_space<vmem>>, %arg13: memref<1x128xf32, #tpu.memory_space<vmem>>, %arg14: memref<8x128xbf16, #tpu.memory_space<vmem>>) attributes {dimension_semantics = [#tpu.dimension_semantics<parallel>], iteration_bounds = array<i64: 1>, scalar_prefetch = 0 : i64, scratch_operands = 0 : i64, tpu.core_type = #tpu.core_type<tc>, window_params = [{transform_indices = @transform_0, window_bounds = array<i64: 8, 1024>}, {pipeline_mode = #tpu.pipeline_mode<synchronous>, transform_indices = @transform_1, window_bounds = array<i64: 1024, 256>}, {pipeline_mode = #tpu.pipeline_mode<synchronous>, transform_indices = @transform_2, window_bounds = array<i64: 1, 256>}, {pipeline_mode = #tpu.pipeline_mode<synchronous>, transform_indices = @transform_3, window_bounds = array<i64: 256, 256>}, {pipeline_mode = #tpu.pipeline_mode<synchronous>, transform_indices = @transform_4, window_bounds = array<i64: 1, 256>}, {pipeline_mode = #tpu.pipeline_mode<synchronous>, transform_indices = @transform_5, window_bounds = array<i64: 256, 256>}, {pipeline_mode = #tpu.pipeline_mode<synchronous>, transform_indices = @transform_6, window_bounds = array<i64: 1, 256>}, {pipeline_mode = #tpu.pipeline_mode<synchronous>, transform_indices = @transform_7, window_bounds = array<i64: 256, 256>}, {pipeline_mode = #tpu.pipeline_mode<synchronous>, transform_indices = @transform_8, window_bounds = array<i64: 1, 256>}, {pipeline_mode = #tpu.pipeline_mode<synchronous>, transform_indices = @transform_9, window_bounds = array<i64: 256, 256>}, {pipeline_mode = #tpu.pipeline_mode<synchronous>, transform_indices = @transform_10, window_bounds = array<i64: 1, 256>}, {pipeline_mode = #tpu.pipeline_mode<synchronous>, transform_indices = @transform_11, window_bounds = array<i64: 512, 128>}, {pipeline_mode = #tpu.pipeline_mode<synchronous>, transform_indices = @transform_12, window_bounds = array<i64: 1, 128>}, {transform_indices = @transform_13, window_bounds = array<i64: 8, 128>}]} {
    %c0 = arith.constant 0 : index
    %c0_0 = arith.constant 0 : index
    %0 = vector.load %arg1[%c0, %c0_0] : memref<8x1024xbf16, #tpu.memory_space<vmem>>, vector<8x1024xbf16>
    %c0_1 = arith.constant 0 : index
    %c0_2 = arith.constant 0 : index
    %1 = vector.load %arg2[%c0_1, %c0_2] : memref<1024x256xbf16, #tpu.memory_space<vmem>>, vector<1024x256xbf16>
    %cst = arith.constant dense<0.000000e+00> : vector<8x256xf32>
    %2 = tpu.matmul %0, %1, %cst {dimension_numbers = #tpu.dot_dimension_numbers<[1], [0], [0], [1], [0, 0, 1, 1], [], []>} : vector<8x1024xbf16>, vector<1024x256xbf16>, vector<8x256xf32> -> vector<8x256xf32>
    %c0_3 = arith.constant 0 : index
    %c0_4 = arith.constant 0 : index
    %3 = vector.load %arg3[%c0_3, %c0_4] : memref<1x256xf32, #tpu.memory_space<vmem>>, vector<1x256xf32>
    %4 = vector.broadcast %3 : vector<1x256xf32> to vector<8x256xf32>
    %5 = arith.addf %2, %4 : vector<8x256xf32>
    %cst_5 = arith.constant 0.000000e+00 : f32
    %6 = vector.broadcast %cst_5 : f32 to vector<8x256xf32>
    %7 = arith.maximumf %5, %6 : vector<8x256xf32>
    %8 = arith.truncf %7 : vector<8x256xf32> to vector<8x256xbf16>
    %c0_6 = arith.constant 0 : index
    %c0_7 = arith.constant 0 : index
    %9 = vector.load %arg4[%c0_6, %c0_7] : memref<256x256xbf16, #tpu.memory_space<vmem>>, vector<256x256xbf16>
    %cst_8 = arith.constant dense<0.000000e+00> : vector<8x256xf32>
    %10 = tpu.matmul %8, %9, %cst_8 {dimension_numbers = #tpu.dot_dimension_numbers<[1], [0], [0], [1], [0, 0, 1, 1], [], []>} : vector<8x256xbf16>, vector<256x256xbf16>, vector<8x256xf32> -> vector<8x256xf32>
    %c0_9 = arith.constant 0 : index
    %c0_10 = arith.constant 0 : index
    %11 = vector.load %arg5[%c0_9, %c0_10] : memref<1x256xf32, #tpu.memory_space<vmem>>, vector<1x256xf32>
    %12 = vector.broadcast %11 : vector<1x256xf32> to vector<8x256xf32>
    %13 = arith.addf %10, %12 : vector<8x256xf32>
    %cst_11 = arith.constant 0.000000e+00 : f32
    %14 = vector.broadcast %cst_11 : f32 to vector<8x256xf32>
    %15 = arith.maximumf %13, %14 : vector<8x256xf32>
    %16 = arith.truncf %15 : vector<8x256xf32> to vector<8x256xbf16>
    %c0_12 = arith.constant 0 : index
    %c0_13 = arith.constant 0 : index
    %17 = vector.load %arg6[%c0_12, %c0_13] : memref<256x256xbf16, #tpu.memory_space<vmem>>, vector<256x256xbf16>
    %cst_14 = arith.constant dense<0.000000e+00> : vector<8x256xf32>
    %18 = tpu.matmul %16, %17, %cst_14 {dimension_numbers = #tpu.dot_dimension_numbers<[1], [0], [0], [1], [0, 0, 1, 1], [], []>} : vector<8x256xbf16>, vector<256x256xbf16>, vector<8x256xf32> -> vector<8x256xf32>
    %c0_15 = arith.constant 0 : index
    %c0_16 = arith.constant 0 : index
    %19 = vector.load %arg7[%c0_15, %c0_16] : memref<1x256xf32, #tpu.memory_space<vmem>>, vector<1x256xf32>
    %20 = vector.broadcast %19 : vector<1x256xf32> to vector<8x256xf32>
    %21 = arith.addf %18, %20 : vector<8x256xf32>
    %cst_17 = arith.constant 0.000000e+00 : f32
    %22 = vector.broadcast %cst_17 : f32 to vector<8x256xf32>
    %23 = arith.maximumf %21, %22 : vector<8x256xf32>
    %24 = arith.truncf %23 : vector<8x256xf32> to vector<8x256xbf16>
    %c0_18 = arith.constant 0 : index
    %c0_19 = arith.constant 0 : index
    %25 = vector.load %arg8[%c0_18, %c0_19] : memref<256x256xbf16, #tpu.memory_space<vmem>>, vector<256x256xbf16>
    %cst_20 = arith.constant dense<0.000000e+00> : vector<8x256xf32>
    %26 = tpu.matmul %24, %25, %cst_20 {dimension_numbers = #tpu.dot_dimension_numbers<[1], [0], [0], [1], [0, 0, 1, 1], [], []>} : vector<8x256xbf16>, vector<256x256xbf16>, vector<8x256xf32> -> vector<8x256xf32>
    %c0_21 = arith.constant 0 : index
    %c0_22 = arith.constant 0 : index
    %27 = vector.load %arg9[%c0_21, %c0_22] : memref<1x256xf32, #tpu.memory_space<vmem>>, vector<1x256xf32>
    %28 = vector.broadcast %27 : vector<1x256xf32> to vector<8x256xf32>
    %29 = arith.addf %26, %28 : vector<8x256xf32>
    %cst_23 = arith.constant 0.000000e+00 : f32
    %30 = vector.broadcast %cst_23 : f32 to vector<8x256xf32>
    %31 = arith.maximumf %29, %30 : vector<8x256xf32>
    %32 = arith.truncf %31 : vector<8x256xf32> to vector<8x256xbf16>
    %c0_24 = arith.constant 0 : index
    %c0_25 = arith.constant 0 : index
    %33 = vector.load %arg10[%c0_24, %c0_25] : memref<256x256xbf16, #tpu.memory_space<vmem>>, vector<256x256xbf16>
    %cst_26 = arith.constant dense<0.000000e+00> : vector<8x256xf32>
    %34 = tpu.matmul %32, %33, %cst_26 {dimension_numbers = #tpu.dot_dimension_numbers<[1], [0], [0], [1], [0, 0, 1, 1], [], []>} : vector<8x256xbf16>, vector<256x256xbf16>, vector<8x256xf32> -> vector<8x256xf32>
    %c0_27 = arith.constant 0 : index
    %c0_28 = arith.constant 0 : index
    %35 = vector.load %arg11[%c0_27, %c0_28] : memref<1x256xf32, #tpu.memory_space<vmem>>, vector<1x256xf32>
    %36 = vector.broadcast %35 : vector<1x256xf32> to vector<8x256xf32>
    %37 = arith.addf %34, %36 : vector<8x256xf32>
    %cst_29 = arith.constant 0.000000e+00 : f32
    %38 = vector.broadcast %cst_29 : f32 to vector<8x256xf32>
    %39 = arith.maximumf %37, %38 : vector<8x256xf32>
    %40 = arith.truncf %39 : vector<8x256xf32> to vector<8x256xbf16>
    %41 = tpu.concatenate %24, %40 in 1 : vector<8x256xbf16>, vector<8x256xbf16> -> vector<8x512xbf16>
    %c0_30 = arith.constant 0 : index
    %c0_31 = arith.constant 0 : index
    %42 = vector.load %arg12[%c0_30, %c0_31] : memref<512x128xbf16, #tpu.memory_space<vmem>>, vector<512x128xbf16>
    %cst_32 = arith.constant dense<0.000000e+00> : vector<8x128xf32>
    %43 = tpu.matmul %41, %42, %cst_32 {dimension_numbers = #tpu.dot_dimension_numbers<[1], [0], [0], [1], [0, 0, 1, 1], [], []>} : vector<8x512xbf16>, vector<512x128xbf16>, vector<8x128xf32> -> vector<8x128xf32>
    %c0_33 = arith.constant 0 : index
    %c0_34 = arith.constant 0 : index
    %44 = vector.load %arg13[%c0_33, %c0_34] : memref<1x128xf32, #tpu.memory_space<vmem>>, vector<1x128xf32>
    %45 = vector.broadcast %44 : vector<1x128xf32> to vector<8x128xf32>
    %46 = arith.addf %43, %45 : vector<8x128xf32>
    %47 = arith.truncf %46 : vector<8x128xf32> to vector<8x128xbf16>
    %c0_35 = arith.constant 0 : index
    %c0_36 = arith.constant 0 : index
    %48 = vector.load %arg14[%c0_35, %c0_36] : memref<8x128xbf16, #tpu.memory_space<vmem>>, vector<8x128xbf16>
    tpu.vector_store %arg14[%c0_35, %c0_36], %47 {strides = array<i32>} : memref<8x128xbf16, #tpu.memory_space<vmem>>, vector<8x128xbf16>,
    return
  }
  func.func @transform_0(%arg0: i32) -> (i32, i32) {
    %c0_i32 = arith.constant 0 : i32
    %c0_i32_0 = arith.constant 0 : i32
    return %arg0, %c0_i32 : i32, i32
  }
  func.func @transform_1(%arg0: i32) -> (i32, i32) {
    %c0_i32 = arith.constant 0 : i32
    %c0_i32_0 = arith.constant 0 : i32
    %c0_i32_1 = arith.constant 0 : i32
    return %c0_i32, %c0_i32_0 : i32, i32
  }
  func.func @transform_2(%arg0: i32) -> (i32, i32) {
    %c0_i32 = arith.constant 0 : i32
    %c0_i32_0 = arith.constant 0 : i32
    %c0_i32_1 = arith.constant 0 : i32
    return %c0_i32, %c0_i32_0 : i32, i32
  }
  func.func @transform_3(%arg0: i32) -> (i32, i32) {
    %c0_i32 = arith.constant 0 : i32
    %c0_i32_0 = arith.constant 0 : i32
    %c0_i32_1 = arith.constant 0 : i32
    return %c0_i32, %c0_i32_0 : i32, i32
  }
  func.func @transform_4(%arg0: i32) -> (i32, i32) {
    %c0_i32 = arith.constant 0 : i32
    %c0_i32_0 = arith.constant 0 : i32
    %c0_i32_1 = arith.constant 0 : i32
    return %c0_i32, %c0_i32_0 : i32, i32
  }
  func.func @transform_5(%arg0: i32) -> (i32, i32) {
    %c0_i32 = arith.constant 0 : i32
    %c0_i32_0 = arith.constant 0 : i32
    %c0_i32_1 = arith.constant 0 : i32
    return %c0_i32, %c0_i32_0 : i32, i32
  }
  func.func @transform_6(%arg0: i32) -> (i32, i32) {
    %c0_i32 = arith.constant 0 : i32
    %c0_i32_0 = arith.constant 0 : i32
    %c0_i32_1 = arith.constant 0 : i32
    return %c0_i32, %c0_i32_0 : i32, i32
  }
  func.func @transform_7(%arg0: i32) -> (i32, i32) {
    %c0_i32 = arith.constant 0 : i32
    %c0_i32_0 = arith.constant 0 : i32
    %c0_i32_1 = arith.constant 0 : i32
    return %c0_i32, %c0_i32_0 : i32, i32
  }
  func.func @transform_8(%arg0: i32) -> (i32, i32) {
    %c0_i32 = arith.constant 0 : i32
    %c0_i32_0 = arith.constant 0 : i32
    %c0_i32_1 = arith.constant 0 : i32
    return %c0_i32, %c0_i32_0 : i32, i32
  }
  func.func @transform_9(%arg0: i32) -> (i32, i32) {
    %c0_i32 = arith.constant 0 : i32
    %c0_i32_0 = arith.constant 0 : i32
    %c0_i32_1 = arith.constant 0 : i32
    return %c0_i32, %c0_i32_0 : i32, i32
  }
  func.func @transform_10(%arg0: i32) -> (i32, i32) {
    %c0_i32 = arith.constant 0 : i32
    %c0_i32_0 = arith.constant 0 : i32
    %c0_i32_1 = arith.constant 0 : i32
    return %c0_i32, %c0_i32_0 : i32, i32
  }
  func.func @transform_11(%arg0: i32) -> (i32, i32) {
    %c0_i32 = arith.constant 0 : i32
    %c0_i32_0 = arith.constant 0 : i32
    %c0_i32_1 = arith.constant 0 : i32
    return %c0_i32, %c0_i32_0 : i32, i32
  }
  func.func @transform_12(%arg0: i32) -> (i32, i32) {
    %c0_i32 = arith.constant 0 : i32
    %c0_i32_0 = arith.constant 0 : i32
    %c0_i32_1 = arith.constant 0 : i32
    return %c0_i32, %c0_i32_0 : i32, i32
  }
  func.func @transform_13(%arg0: i32) -> (i32, i32) {
    %c0_i32 = arith.constant 0 : i32
    %c0_i32_0 = arith.constant 0 : i32
    return %arg0, %c0_i32 : i32, i32
  }
}

</mosaic_0001>

<bundles_post_ra>
// kernel: _lambda_.1
= control target key start
LH: loop header
LB: loop body
LE: loop exit
PB: predicated region body
PF: predicated region fallthrough
CT: control target
= control target key end

     0   :  { %s4148_s1 = inlined_call_operand.vmem [shape: bf16[1024,256], index: 1, kind: input, shape index: {}]   ;;  %s4149_s0 = inlined_call_operand.vmem [shape: bf16[8,1024], index: 0, kind: input, shape index: {}]   ;;  %s4150_s3 = inlined_call_operand.vmem [shape: bf16[256,256], index: 3, kind: input, shape index: {}]   ;;  %s4151_s5 = inlined_call_operand.vmem [shape: bf16[256,256], index: 5, kind: input, shape index: {}]   ;;  %s4152_s2 = inlined_call_operand.vmem [shape: f32[1,256], index: 2, kind: input, shape index: {}]   ;;  %s4153_s7 = inlined_call_operand.vmem [shape: bf16[256,256], index: 7, kind: input, shape index: {}]   ;;  %s4154_s11 = inlined_call_operand.vmem [shape: bf16[512,128], index: 11, kind: input, shape index: {}]   ;;  %s4155_s4 = inlined_call_operand.vmem [shape: f32[1,256], index: 4, kind: input, shape index: {}]   ;;  %s4156_s9 = inlined_call_operand.vmem [shape: bf16[256,256], index: 9, kind: input, shape index: {}]   ;;  %s4157_s6 = inlined_call_operand.vmem [shape: f32[1,256], index: 6, kind: input, shape index: {}]   ;;  %s4158_s8 = inlined_call_operand.vmem [shape: f32[1,256], index: 8, kind: input, shape index: {}]   ;;  %s4159_s10 = inlined_call_operand.vmem [shape: f32[1,256], index: 10, kind: input, shape index: {}]   ;;  %s4160_s12 = inlined_call_operand.vmem [shape: f32[1,128], index: 12, kind: input, shape index: {}]   ;;  %s4161_s13 = inlined_call_operand.vmem [shape: bf16[8,128], index: 13, kind: output, shape index: {}]  }
   0x1   :  { %v2725_v0 = vld [vmem:[%s4148_s1 + $0x4] ss:$8 sps:$4 sm:$0xff]   ;;  %v2727_v1 = vld [vmem:[%s4148_s1] ss:$8 sps:$4 sm:$0xff]   ;;  %v2728_v2 = vld [vmem:[%s4148_s1 + $0x14] ss:$8 sps:$4 sm:$0xff]  }
   0x2   :  { %857 = vmatprep.subr.bf16.mxu0 %v2725_v0  ;;  %v2730_v3 = vld [vmem:[%s4148_s1 + $0x10] ss:$8 sps:$4 sm:$0xff]   ;;  %v2731_v4 = vld [vmem:[%s4148_s1 + $0x24] ss:$8 sps:$4 sm:$0xff]   ;;  %v2733_v5 = vld [vmem:[%s4148_s1 + $0x20] ss:$8 sps:$4 sm:$0xff]  }
   0x3   :  { %858 = vmatpush1.bf16.msra.mxu0 %v2727_v1  ;;  %v2734_v6 = vld [vmem:[%s4148_s1 + $0x34] ss:$8 sps:$4 sm:$0xff]   ;;  %v2736_v7 = vld [vmem:[%s4148_s1 + $0x30] ss:$8 sps:$4 sm:$0xff]   ;;  %v2737_v8 = vld [vmem:[%s4148_s1 + $0x44] ss:$8 sps:$4 sm:$0xff]  }
   0x4   :  { %859 = vmatprep.subr.bf16.mxu0 %v2728_v2  ;;  %v2739_v9 = vld [vmem:[%s4148_s1 + $0x40] ss:$8 sps:$4 sm:$0xff]   ;;  %v2740_v10 = vld [vmem:[%s4148_s1 + $0x54] ss:$8 sps:$4 sm:$0xff]   ;;  %v2742_v11 = vld [vmem:[%s4148_s1 + $0x50] ss:$8 sps:$4 sm:$0xff]  }
   0x5   :  { %v2743_v12 = vld [vmem:[%s4148_s1 + $0x64] ss:$8 sps:$4 sm:$0xff]   ;;  %v2745_v15 = vld [vmem:[%s4148_s1 + $0x60] ss:$8 sps:$4 sm:$0xff]   ;;  %v2746_v16 = vld [vmem:[%s4148_s1 + $0x74] ss:$8 sps:$4 sm:$0xff]  }
   0x6   :  { %v45_v13 = vld [vmem:[%s4149_s0] sm:$0xff]  ;;  %v2748_v17 = vld [vmem:[%s4148_s1 + $0x70] ss:$8 sps:$4 sm:$0xff]   ;;  %v2752_v20 = vld [vmem:[%s4148_s1 + $0x94] ss:$8 sps:$4 sm:$0xff]  }
   0x7   :  { %860 = vmatpush1.bf16.msra.mxu0 %v2730_v3  ;;  %v2371_v14 = vcombine.high %v45_v13, %v45_v13  ;;  %v2749_v18 = vld [vmem:[%s4148_s1 + $0x84] ss:$8 sps:$4 sm:$0xff]   ;;  %v2751_v19 = vld [vmem:[%s4148_s1 + $0x80] ss:$8 sps:$4 sm:$0xff]   ;;  %v2754_v21 = vld [vmem:[%s4148_s1 + $0x90] ss:$8 sps:$4 sm:$0xff]   ;;  %v2370_v36 = vcombine.low %v45_v13, %v45_v13 }
   0x8   :  { %861 = vmatprep.subr.bf16.mxu0 %v2731_v4  ;;  %v2755_v22 = vld [vmem:[%s4148_s1 + $0xa4] ss:$8 sps:$4 sm:$0xff]   ;;  %v2757_v23 = vld [vmem:[%s4148_s1 + $0xa0] ss:$8 sps:$4 sm:$0xff]   ;;  %v2758_v24 = vld [vmem:[%s4148_s1 + $0xb4] ss:$8 sps:$4 sm:$0xff]  }
   0x9   :  { %889 = vmatprep.mubr.bf16.mxu0 %v2371_v14  ;;  %v2760_v25 = vld [vmem:[%s4148_s1 + $0xb0] ss:$8 sps:$4 sm:$0xff]   ;;  %v2761_v26 = vld [vmem:[%s4148_s1 + $0xc4] ss:$8 sps:$4 sm:$0xff]   ;;  %v2763_v27 = vld [vmem:[%s4148_s1 + $0xc0] ss:$8 sps:$4 sm:$0xff]  }
   0xa   :  { %v2764_v28 = vld [vmem:[%s4148_s1 + $0xd4] ss:$8 sps:$4 sm:$0xff]   ;;  %v2766_v29 = vld [vmem:[%s4148_s1 + $0xd0] ss:$8 sps:$4 sm:$0xff]   ;;  %v2767_v30 = vld [vmem:[%s4148_s1 + $0xe4] ss:$8 sps:$4 sm:$0xff]  }
   0xb   :  { %862 = vmatpush1.bf16.msra.mxu0 %v2733_v5  ;;  %v2769_v31 = vld [vmem:[%s4148_s1 + $0xe0] ss:$8 sps:$4 sm:$0xff]   ;;  %v2770_v32 = vld [vmem:[%s4148_s1 + $0xf4] ss:$8 sps:$4 sm:$0xff]   ;;  %v2772_v33 = vld [vmem:[%s4148_s1 + $0xf0] ss:$8 sps:$4 sm:$0xff]  }
   0xc   :  { %863 = vmatprep.subr.bf16.mxu0 %v2734_v6  ;;  %v2777_v34 = vld [vmem:[%s4148_s1 + $0x104] ss:$8 sps:$4 sm:$0xff]   ;;  %v2775_v37 = vld [vmem:[%s4148_s1 + $0x100] ss:$8 sps:$4 sm:$0xff]   ;;  %v2780_v39 = vld [vmem:[%s4148_s1 + $0x114] ss:$8 sps:$4 sm:$0xff]  }
   0xd   :  { %v3324_v35 = vld [vmem:[%s4149_s0 + $0x8] sm:$0xff]  ;;  %v2778_v40 = vld [vmem:[%s4148_s1 + $0x110] ss:$8 sps:$4 sm:$0xff]   ;;  %v2786_v43 = vld [vmem:[%s4148_s1 + $0x134] ss:$8 sps:$4 sm:$0xff]  }
   0xe   :  { %v2373_v38 = vcombine.high %v3324_v35, %v3324_v35  ;;  %v2783_v41 = vld [vmem:[%s4148_s1 + $0x124] ss:$8 sps:$4 sm:$0xff]   ;;  %v2781_v42 = vld [vmem:[%s4148_s1 + $0x120] ss:$8 sps:$4 sm:$0xff]   ;;  %v2784_v44 = vld [vmem:[%s4148_s1 + $0x130] ss:$8 sps:$4 sm:$0xff]  }
   0xf   :  { %864 = vmatpush1.bf16.msra.mxu0 %v2736_v7  ;;  %v2789_v45 = vld [vmem:[%s4148_s1 + $0x144] ss:$8 sps:$4 sm:$0xff]   ;;  %v2787_v46 = vld [vmem:[%s4148_s1 + $0x140] ss:$8 sps:$4 sm:$0xff]   ;;  %v2792_v47 = vld [vmem:[%s4148_s1 + $0x154] ss:$8 sps:$4 sm:$0xff]   ;;  %v2372_v7 = vcombine.low %v3324_v35, %v3324_v35 }
  0x10   :  { %865 = vmatprep.subr.bf16.mxu0 %v2737_v8  ;;  %v2790_v48 = vld [vmem:[%s4148_s1 + $0x150] ss:$8 sps:$4 sm:$0xff]   ;;  %v2795_v49 = vld [vmem:[%s4148_s1 + $0x164] ss:$8 sps:$4 sm:$0xff]   ;;  %v2793_v50 = vld [vmem:[%s4148_s1 + $0x160] ss:$8 sps:$4 sm:$0xff]  }
  0x11   :  { %v2798_v51 = vld [vmem:[%s4148_s1 + $0x174] ss:$8 sps:$4 sm:$0xff]   ;;  %v2796_v52 = vld [vmem:[%s4148_s1 + $0x170] ss:$8 sps:$4 sm:$0xff]   ;;  %v2801_v53 = vld [vmem:[%s4148_s1 + $0x184] ss:$8 sps:$4 sm:$0xff]  }
  0x12   :  { %v2799_v54 = vld [vmem:[%s4148_s1 + $0x180] ss:$8 sps:$4 sm:$0xff]   ;;  %v2804_v55 = vld [vmem:[%s4148_s1 + $0x194] ss:$8 sps:$4 sm:$0xff]   ;;  %v2802_v56 = vld [vmem:[%s4148_s1 + $0x190] ss:$8 sps:$4 sm:$0xff]  }
  0x13   :  { %866 = vmatpush1.bf16.msra.mxu0 %v2739_v9  ;;  %v2807_v57 = vld [vmem:[%s4148_s1 + $0x1a4] ss:$8 sps:$4 sm:$0xff]   ;;  %v2805_v58 = vld [vmem:[%s4148_s1 + $0x1a0] ss:$8 sps:$4 sm:$0xff]   ;;  %v2810_v59 = vld [vmem:[%s4148_s1 + $0x1b4] ss:$8 sps:$4 sm:$0xff]  }
  0x14   :  { %867 = vmatprep.subr.bf16.mxu0 %v2740_v10  ;;  %v2808_v60 = vld [vmem:[%s4148_s1 + $0x1b0] ss:$8 sps:$4 sm:$0xff]   ;;  %v2813_v61 = vld [vmem:[%s4148_s1 + $0x1c4] ss:$8 sps:$4 sm:$0xff]   ;;  %v2811_v62 = vld [vmem:[%s4148_s1 + $0x1c0] ss:$8 sps:$4 sm:$0xff]  }
  0x15   :  { %v2816_v63 = vld [vmem:[%s4148_s1 + $0x1d4] ss:$8 sps:$4 sm:$0xff]   ;;  %v2814_v0 = vld [vmem:[%s4148_s1 + $0x1d0] ss:$8 sps:$4 sm:$0xff]   ;;  %v2819_v1 = vld [vmem:[%s4148_s1 + $0x1e4] ss:$8 sps:$4 sm:$0xff]  }
  0x16   :  { %v2817_v2 = vld [vmem:[%s4148_s1 + $0x1e0] ss:$8 sps:$4 sm:$0xff]   ;;  %v2822_v3 = vld [vmem:[%s4148_s1 + $0x1f4] ss:$8 sps:$4 sm:$0xff]   ;;  %v2820_v4 = vld [vmem:[%s4148_s1 + $0x1f0] ss:$8 sps:$4 sm:$0xff]  }
  0x17   :  { %868 = vmatpush1.bf16.msra.mxu0 %v2742_v11  ;;  %v2827_v5 = vld [vmem:[%s4148_s1 + $0x204] ss:$8 sps:$4 sm:$0xff]   ;;  %v3427_v6 = vld [vmem:[%s4149_s0 + $0x10] sm:$0xff]  ;;  %v2825_v8 = vld [vmem:[%s4148_s1 + $0x200] ss:$8 sps:$4 sm:$0xff]  }
  0x18   :  { %869 = vmatprep.subr.bf16.mxu0 %v2743_v12  ;;  %v2375_v9 = vcombine.high %v3427_v6, %v3427_v6  ;;  %v2830_v10 = vld [vmem:[%s4148_s1 + $0x214] ss:$8 sps:$4 sm:$0xff]   ;;  %v2828_v11 = vld [vmem:[%s4148_s1 + $0x210] ss:$8 sps:$4 sm:$0xff]   ;;  %v2833_v12 = vld [vmem:[%s4148_s1 + $0x224] ss:$8 sps:$4 sm:$0xff]  }
  0x19   :  { %v2925_v13 = vld [vmem:[%s4150_s3 + $0x4] ss:$8 sps:$4 sm:$0xff]   ;;  %v2927_v14 = vld [vmem:[%s4150_s3] ss:$8 sps:$4 sm:$0xff]   ;;  %v2848_v35 = vld [vmem:[%s4148_s1 + $0x274] ss:$8 sps:$4 sm:$0xff]  }
  0x1a   :  { %1229 = vmatprep.subr.bf16.mxu1 %v2925_v13  ;;  %v2886_v13 = vld [vmem:[%s4148_s1 + $0x334] ss:$8 sps:$4 sm:$0xff]  }
  0x1b   :  { %870 = vmatpush1.bf16.msra.mxu0 %v2745_v15  ;;  %v2928_v15 = vld [vmem:[%s4150_s3 + $0x14] ss:$8 sps:$4 sm:$0xff]   ;;  %1230 = vmatpush1.bf16.msra.mxu1 %v2927_v14  ;;  %v2884_v14 = vld [vmem:[%s4148_s1 + $0x330] ss:$8 sps:$4 sm:$0xff]  }
  0x1c   :  { %871 = vmatprep.subr.bf16.mxu0 %v2746_v16  ;;  %v2831_v16 = vld [vmem:[%s4148_s1 + $0x220] ss:$8 sps:$4 sm:$0xff]   ;;  %1231 = vmatprep.subr.bf16.mxu1 %v2928_v15  ;;  %v2889_v15 = vld [vmem:[%s4148_s1 + $0x344] ss:$8 sps:$4 sm:$0xff]  }
  0x1f   :  { %872 = vmatpush1.bf16.msra.mxu0 %v2748_v17  ;;  %v2930_v17 = vld [vmem:[%s4150_s3 + $0x10] ss:$8 sps:$4 sm:$0xff]  }
  0x20   :  { %873 = vmatprep.subr.bf16.mxu0 %v2749_v18  ;;  %v2931_v18 = vld [vmem:[%s4150_s3 + $0x24] ss:$8 sps:$4 sm:$0xff]   ;;  %1232 = vmatpush1.bf16.msra.mxu1 %v2930_v17  ;;  %v2892_v17 = vld [vmem:[%s4148_s1 + $0x354] ss:$8 sps:$4 sm:$0xff]  }
  0x21   :  { %1233 = vmatprep.subr.bf16.mxu1 %v2931_v18  ;;  %v2890_v18 = vld [vmem:[%s4148_s1 + $0x350] ss:$8 sps:$4 sm:$0xff]  }
  0x23   :  { %874 = vmatpush1.bf16.msra.mxu0 %v2751_v19  ;;  %v2836_v19 = vld [vmem:[%s4148_s1 + $0x234] ss:$8 sps:$4 sm:$0xff]  }
  0x24   :  { %875 = vmatprep.subr.bf16.mxu0 %v2752_v20  ;;  %v2834_v20 = vld [vmem:[%s4148_s1 + $0x230] ss:$8 sps:$4 sm:$0xff]  }
  0x27   :  { %876 = vmatpush1.bf16.msra.mxu0 %v2754_v21  ;;  %v2933_v21 = vld [vmem:[%s4150_s3 + $0x20] ss:$8 sps:$4 sm:$0xff]  }
  0x28   :  { %877 = vmatprep.subr.bf16.mxu0 %v2755_v22  ;;  %v2934_v22 = vld [vmem:[%s4150_s3 + $0x34] ss:$8 sps:$4 sm:$0xff]   ;;  %1234 = vmatpush1.bf16.msra.mxu1 %v2933_v21 }
  0x29   :  { %1235 = vmatprep.subr.bf16.mxu1 %v2934_v22  ;;  %v2898_v21 = vld [vmem:[%s4148_s1 + $0x374] ss:$8 sps:$4 sm:$0xff]   ;;  %v2896_v22 = vld [vmem:[%s4148_s1 + $0x370] ss:$8 sps:$4 sm:$0xff]  }
  0x2b   :  { %878 = vmatpush1.bf16.msra.mxu0 %v2757_v23  ;;  %v2839_v23 = vld [vmem:[%s4148_s1 + $0x244] ss:$8 sps:$4 sm:$0xff]  }
  0x2c   :  { %879 = vmatprep.subr.bf16.mxu0 %v2758_v24  ;;  %v2837_v24 = vld [vmem:[%s4148_s1 + $0x240] ss:$8 sps:$4 sm:$0xff]  }
  0x2f   :  { %880 = vmatpush1.bf16.msra.mxu0 %v2760_v25  ;;  %v2936_v25 = vld [vmem:[%s4150_s3 + $0x30] ss:$8 sps:$4 sm:$0xff]  }
  0x30   :  { %881 = vmatprep.subr.bf16.mxu0 %v2761_v26  ;;  %v2937_v26 = vld [vmem:[%s4150_s3 + $0x44] ss:$8 sps:$4 sm:$0xff]   ;;  %1236 = vmatpush1.bf16.msra.mxu1 %v2936_v25  ;;  %v2904_v25 = vld [vmem:[%s4148_s1 + $0x394] ss:$8 sps:$4 sm:$0xff]  }
  0x31   :  { %1237 = vmatprep.subr.bf16.mxu1 %v2937_v26  ;;  %v2902_v26 = vld [vmem:[%s4148_s1 + $0x390] ss:$8 sps:$4 sm:$0xff]  }
  0x33   :  { %882 = vmatpush1.bf16.msra.mxu0 %v2763_v27  ;;  %v2842_v27 = vld [vmem:[%s4148_s1 + $0x254] ss:$8 sps:$4 sm:$0xff]  }
  0x34   :  { %883 = vmatprep.subr.bf16.mxu0 %v2764_v28  ;;  %v2840_v28 = vld [vmem:[%s4148_s1 + $0x250] ss:$8 sps:$4 sm:$0xff]  }
  0x37   :  { %884 = vmatpush1.bf16.msra.mxu0 %v2766_v29  ;;  %v2939_v29 = vld [vmem:[%s4150_s3 + $0x40] ss:$8 sps:$4 sm:$0xff]  }
  0x38   :  { %885 = vmatprep.subr.bf16.mxu0 %v2767_v30  ;;  %v2940_v30 = vld [vmem:[%s4150_s3 + $0x54] ss:$8 sps:$4 sm:$0xff]   ;;  %1238 = vmatpush1.bf16.msra.mxu1 %v2939_v29 }
  0x39   :  { %1239 = vmatprep.subr.bf16.mxu1 %v2940_v30  ;;  %v2910_v29 = vld [vmem:[%s4148_s1 + $0x3b4] ss:$8 sps:$4 sm:$0xff]   ;;  %v2908_v30 = vld [vmem:[%s4148_s1 + $0x3b0] ss:$8 sps:$4 sm:$0xff]  }
  0x3b   :  { %886 = vmatpush1.bf16.msra.mxu0 %v2769_v31  ;;  %v2845_v31 = vld [vmem:[%s4148_s1 + $0x264] ss:$8 sps:$4 sm:$0xff]  }
  0x3c   :  { %887 = vmatprep.subr.bf16.mxu0 %v2770_v32  ;;  %v2942_v32 = vld [vmem:[%s4150_s3 + $0x50] ss:$8 sps:$4 sm:$0xff]  }
  0x3d   :  { %1240 = vmatpush1.bf16.msra.mxu1 %v2942_v32  ;;  %v2911_v32 = vld [vmem:[%s4148_s1 + $0x3c0] ss:$8 sps:$4 sm:$0xff]  }
  0x3f   :  { %888 = vmatpush1.bf16.msra.mxu0 %v2772_v33  ;;  %v2843_v33 = vld [vmem:[%s4148_s1 + $0x260] ss:$8 sps:$4 sm:$0xff]  }
  0x40   :  { %898 = vmatprep.subr.bf16.mxu0 %v2777_v34  ;;  %v2943_v34 = vld [vmem:[%s4150_s3 + $0x64] ss:$8 sps:$4 sm:$0xff]  }
  0x41   :  { %1241 = vmatprep.subr.bf16.mxu1 %v2943_v34  ;;  %v2914_v34 = vld [vmem:[%s4148_s1 + $0x3d0] ss:$8 sps:$4 sm:$0xff]  }
  0x42   :  { %890 = vmatmul.mubr.bf16.vlgmr.msra.gmra.mrb[0].mxu0 %v2370_v36  ;;  %v2945_v36 = vld [vmem:[%s4150_s3 + $0x60] ss:$8 sps:$4 sm:$0xff]  }
  0x43   :  { %899 = vmatpush1.bf16.msra.mxu0 %v2775_v37  ;;  %930 = vmatprep.mubr.bf16.mxu0 %v2373_v38  ;;  %v2846_v37 = vld [vmem:[%s4148_s1 + $0x270] ss:$8 sps:$4 sm:$0xff]   ;;  %v2946_v38 = vld [vmem:[%s4150_s3 + $0x74] ss:$8 sps:$4 sm:$0xff]  }
  0x44   :  { %900 = vmatprep.subr.bf16.mxu0 %v2780_v39  ;;  %v2851_v39 = vld [vmem:[%s4148_s1 + $0x284] ss:$8 sps:$4 sm:$0xff]   ;;  %1242 = vmatpush1.bf16.msra.mxu1 %v2945_v36  ;;  %v2917_v36 = vld [vmem:[%s4148_s1 + $0x3e0] ss:$8 sps:$4 sm:$0xff]  }
  0x45   :  { %1243 = vmatprep.subr.bf16.mxu1 %v2946_v38  ;;  %v2920_v38 = vld [vmem:[%s4148_s1 + $0x3f0] ss:$8 sps:$4 sm:$0xff]  }
  0x47   :  { %901 = vmatpush1.bf16.msra.mxu0 %v2778_v40  ;;  %v2948_v40 = vld [vmem:[%s4150_s3 + $0x70] ss:$8 sps:$4 sm:$0xff]  }
  0x48   :  { %902 = vmatprep.subr.bf16.mxu0 %v2783_v41  ;;  %v2849_v41 = vld [vmem:[%s4148_s1 + $0x280] ss:$8 sps:$4 sm:$0xff]   ;;  %1244 = vmatpush1.bf16.msra.mxu1 %v2948_v40  ;;  %v2967_v40 = vld [vmem:[%s4150_s3 + $0xe4] ss:$8 sps:$4 sm:$0xff]  }
  0x4b   :  { %903 = vmatpush1.bf16.msra.mxu0 %v2781_v42  ;;  %v2949_v42 = vld [vmem:[%s4150_s3 + $0x84] ss:$8 sps:$4 sm:$0xff]  }
  0x4c   :  { %904 = vmatprep.subr.bf16.mxu0 %v2786_v43  ;;  %v2854_v43 = vld [vmem:[%s4148_s1 + $0x294] ss:$8 sps:$4 sm:$0xff]   ;;  %1245 = vmatprep.subr.bf16.mxu1 %v2949_v42 }
  0x4d   :  { %v2970_v42 = vld [vmem:[%s4150_s3 + $0xf4] ss:$8 sps:$4 sm:$0xff]  }
  0x4f   :  { %905 = vmatpush1.bf16.msra.mxu0 %v2784_v44  ;;  %v2951_v44 = vld [vmem:[%s4150_s3 + $0x80] ss:$8 sps:$4 sm:$0xff]  }
  0x50   :  { %906 = vmatprep.subr.bf16.mxu0 %v2789_v45  ;;  %v2852_v45 = vld [vmem:[%s4148_s1 + $0x290] ss:$8 sps:$4 sm:$0xff]   ;;  %1246 = vmatpush1.bf16.msra.mxu1 %v2951_v44  ;;  %v2975_v44 = vld [vmem:[%s4151_s5 + $0x4] ss:$8 sps:$4 sm:$0xff]  }
  0x53   :  { %907 = vmatpush1.bf16.msra.mxu0 %v2787_v46  ;;  %v2952_v46 = vld [vmem:[%s4150_s3 + $0x94] ss:$8 sps:$4 sm:$0xff]  }
  0x54   :  { %908 = vmatprep.subr.bf16.mxu0 %v2792_v47  ;;  %v2857_v47 = vld [vmem:[%s4148_s1 + $0x2a4] ss:$8 sps:$4 sm:$0xff]   ;;  %1247 = vmatprep.subr.bf16.mxu1 %v2952_v46 }
  0x57   :  { %909 = vmatpush1.bf16.msra.mxu0 %v2790_v48  ;;  %v2954_v48 = vld [vmem:[%s4150_s3 + $0x90] ss:$8 sps:$4 sm:$0xff]  }
  0x58   :  { %910 = vmatprep.subr.bf16.mxu0 %v2795_v49  ;;  %v2855_v49 = vld [vmem:[%s4148_s1 + $0x2a0] ss:$8 sps:$4 sm:$0xff]   ;;  %1248 = vmatpush1.bf16.msra.mxu1 %v2954_v48 }
  0x59   :  { %v177_v48 = vld [vmem:[%s4152_s2] sm:$0x3] }
  0x5b   :  { %911 = vmatpush1.bf16.msra.mxu0 %v2793_v50  ;;  %v2955_v50 = vld [vmem:[%s4150_s3 + $0xa4] ss:$8 sps:$4 sm:$0xff]  }
  0x5c   :  { %912 = vmatprep.subr.bf16.mxu0 %v2798_v51  ;;  %v2860_v51 = vld [vmem:[%s4148_s1 + $0x2b4] ss:$8 sps:$4 sm:$0xff]   ;;  %1249 = vmatprep.subr.bf16.mxu1 %v2955_v50 }
  0x5f   :  { %913 = vmatpush1.bf16.msra.mxu0 %v2796_v52  ;;  %v2957_v52 = vld [vmem:[%s4150_s3 + $0xa0] ss:$8 sps:$4 sm:$0xff]  }
  0x60   :  { %914 = vmatprep.subr.bf16.mxu0 %v2801_v53  ;;  %v2858_v53 = vld [vmem:[%s4148_s1 + $0x2b0] ss:$8 sps:$4 sm:$0xff]   ;;  %1250 = vmatpush1.bf16.msra.mxu1 %v2957_v52 }
  0x63   :  { %915 = vmatpush1.bf16.msra.mxu0 %v2799_v54  ;;  %v2958_v54 = vld [vmem:[%s4150_s3 + $0xb4] ss:$8 sps:$4 sm:$0xff]  }
  0x64   :  { %916 = vmatprep.subr.bf16.mxu0 %v2804_v55  ;;  %v2863_v55 = vld [vmem:[%s4148_s1 + $0x2c4] ss:$8 sps:$4 sm:$0xff]   ;;  %1251 = vmatprep.subr.bf16.mxu1 %v2958_v54 }
  0x67   :  { %917 = vmatpush1.bf16.msra.mxu0 %v2802_v56  ;;  %v2960_v56 = vld [vmem:[%s4150_s3 + $0xb0] ss:$8 sps:$4 sm:$0xff]  }
  0x68   :  { %918 = vmatprep.subr.bf16.mxu0 %v2807_v57  ;;  %v2861_v57 = vld [vmem:[%s4148_s1 + $0x2c0] ss:$8 sps:$4 sm:$0xff]   ;;  %1252 = vmatpush1.bf16.msra.mxu1 %v2960_v56 }
  0x6b   :  { %919 = vmatpush1.bf16.msra.mxu0 %v2805_v58  ;;  %v2961_v58 = vld [vmem:[%s4150_s3 + $0xc4] ss:$8 sps:$4 sm:$0xff]  }
  0x6c   :  { %920 = vmatprep.subr.bf16.mxu0 %v2810_v59  ;;  %v2866_v59 = vld [vmem:[%s4148_s1 + $0x2d4] ss:$8 sps:$4 sm:$0xff]   ;;  %1253 = vmatprep.subr.bf16.mxu1 %v2961_v58 }
  0x6f   :  { %921 = vmatpush1.bf16.msra.mxu0 %v2808_v60  ;;  %v2963_v60 = vld [vmem:[%s4150_s3 + $0xc0] ss:$8 sps:$4 sm:$0xff]  }
  0x70   :  { %922 = vmatprep.subr.bf16.mxu0 %v2813_v61  ;;  %v2864_v61 = vld [vmem:[%s4148_s1 + $0x2d0] ss:$8 sps:$4 sm:$0xff]   ;;  %1254 = vmatpush1.bf16.msra.mxu1 %v2963_v60 }
  0x73   :  { %923 = vmatpush1.bf16.msra.mxu0 %v2811_v62  ;;  %v2964_v62 = vld [vmem:[%s4150_s3 + $0xd4] ss:$8 sps:$4 sm:$0xff]  }
  0x74   :  { %924 = vmatprep.subr.bf16.mxu0 %v2816_v63  ;;  %v2869_v63 = vld [vmem:[%s4148_s1 + $0x2e4] ss:$8 sps:$4 sm:$0xff]   ;;  %1255 = vmatprep.subr.bf16.mxu1 %v2964_v62 }
  0x77   :  { %925 = vmatpush1.bf16.msra.mxu0 %v2814_v0  ;;  %v2966_v0 = vld [vmem:[%s4150_s3 + $0xd0] ss:$8 sps:$4 sm:$0xff]  }
  0x78   :  { %926 = vmatprep.subr.bf16.mxu0 %v2819_v1  ;;  %v2867_v1 = vld [vmem:[%s4148_s1 + $0x2e0] ss:$8 sps:$4 sm:$0xff]   ;;  %1256 = vmatpush1.bf16.msra.mxu1 %v2966_v0  ;;  %v2976_v0 = vld [vmem:[%s4151_s5 + $0x10] ss:$8 sps:$4 sm:$0xff]  }
  0x79   :  { %1257 = vmatprep.subr.bf16.mxu1 %v2967_v40  ;;  %v3073_v40 = vld [vmem:[%s4154_s11 + $0x68] sm:$0xff]  }
  0x7b   :  { %927 = vmatpush1.bf16.msra.mxu0 %v2817_v2  ;;  %v2872_v2 = vld [vmem:[%s4148_s1 + $0x2f4] ss:$8 sps:$4 sm:$0xff]  }
  0x7c   :  { %928 = vmatprep.subr.bf16.mxu0 %v2822_v3  ;;  %v2870_v3 = vld [vmem:[%s4148_s1 + $0x2f0] ss:$8 sps:$4 sm:$0xff]  }
  0x7f   :  { %929 = vmatpush1.bf16.msra.mxu0 %v2820_v4  ;;  %v2877_v4 = vld [vmem:[%s4148_s1 + $0x304] ss:$8 sps:$4 sm:$0xff]  }
  0x80   :  { %939 = vmatprep.subr.bf16.mxu0 %v2827_v5  ;;  %v3616_v5 = vld [vmem:[%s4149_s0 + $0x18] sm:$0xff] }
  0x82   :  { %931 = vmatmul.mubr.bf16.vlgmr.msra.gmra.mrb[0].mxu0 %v2372_v7  ;;  %v2374_v7 = vcombine.low %v3427_v6, %v3427_v6  ;;  %v2883_v6 = vld [vmem:[%s4148_s1 + $0x324] ss:$8 sps:$4 sm:$0xff]  }
  0x83   :  { %940 = vmatpush1.bf16.msra.mxu0 %v2825_v8  ;;  %971 = vmatprep.mubr.bf16.mxu0 %v2375_v9  ;;  %v2875_v8 = vld [vmem:[%s4148_s1 + $0x300] ss:$8 sps:$4 sm:$0xff]   ;;  %v2377_v9 = vcombine.high %v3616_v5, %v3616_v5 }
  0x84   :  { %941 = vmatprep.subr.bf16.mxu0 %v2830_v10  ;;  %v2880_v10 = vld [vmem:[%s4148_s1 + $0x314] ss:$8 sps:$4 sm:$0xff]  }
  0x87   :  { %942 = vmatpush1.bf16.msra.mxu0 %v2828_v11  ;;  %v2878_v11 = vld [vmem:[%s4148_s1 + $0x310] ss:$8 sps:$4 sm:$0xff]  }
  0x88   :  { %943 = vmatprep.subr.bf16.mxu0 %v2833_v12  ;;  %v2881_v12 = vld [vmem:[%s4148_s1 + $0x320] ss:$8 sps:$4 sm:$0xff]  }
  0x8b   :  { %944 = vmatpush1.bf16.msra.mxu0 %v2831_v16  ;;  %v2887_v16 = vld [vmem:[%s4148_s1 + $0x340] ss:$8 sps:$4 sm:$0xff]  }
  0x8c   :  { %945 = vmatprep.subr.bf16.mxu0 %v2836_v19  ;;  %v2895_v19 = vld [vmem:[%s4148_s1 + $0x364] ss:$8 sps:$4 sm:$0xff]  }
  0x8f   :  { %946 = vmatpush1.bf16.msra.mxu0 %v2834_v20  ;;  %v2893_v20 = vld [vmem:[%s4148_s1 + $0x360] ss:$8 sps:$4 sm:$0xff]  }
  0x90   :  { %947 = vmatprep.subr.bf16.mxu0 %v2839_v23  ;;  %v2901_v23 = vld [vmem:[%s4148_s1 + $0x384] ss:$8 sps:$4 sm:$0xff]  }
  0x93   :  { %948 = vmatpush1.bf16.msra.mxu0 %v2837_v24  ;;  %v2899_v24 = vld [vmem:[%s4148_s1 + $0x380] ss:$8 sps:$4 sm:$0xff]  }
  0x94   :  { %949 = vmatprep.subr.bf16.mxu0 %v2842_v27  ;;  %v2907_v27 = vld [vmem:[%s4148_s1 + $0x3a4] ss:$8 sps:$4 sm:$0xff]  }
  0x97   :  { %950 = vmatpush1.bf16.msra.mxu0 %v2840_v28  ;;  %v2905_v28 = vld [vmem:[%s4148_s1 + $0x3a0] ss:$8 sps:$4 sm:$0xff]  }
  0x98   :  { %951 = vmatprep.subr.bf16.mxu0 %v2845_v31  ;;  %v2913_v31 = vld [vmem:[%s4148_s1 + $0x3c4] ss:$8 sps:$4 sm:$0xff]  }
  0x9b   :  { %952 = vmatpush1.bf16.msra.mxu0 %v2843_v33  ;;  %v2916_v33 = vld [vmem:[%s4148_s1 + $0x3d4] ss:$8 sps:$4 sm:$0xff]  }
  0x9c   :  { %953 = vmatprep.subr.bf16.mxu0 %v2848_v35  ;;  %v2919_v35 = vld [vmem:[%s4148_s1 + $0x3e4] ss:$8 sps:$4 sm:$0xff]  }
  0x9f   :  { %954 = vmatpush1.bf16.msra.mxu0 %v2846_v37  ;;  %v2922_v37 = vld [vmem:[%s4148_s1 + $0x3f4] ss:$8 sps:$4 sm:$0xff]  }
  0xa0   :  { %955 = vmatprep.subr.bf16.mxu0 %v2851_v39  ;;  %v2376_v39 = vcombine.low %v3616_v5, %v3616_v5  ;;  %v2987_v5 = vld [vmem:[%s4151_s5 + $0x44] ss:$8 sps:$4 sm:$0xff]  }
  0xa3   :  { %956 = vmatpush1.bf16.msra.mxu0 %v2849_v41  ;;  %v2969_v41 = vld [vmem:[%s4150_s3 + $0xe0] ss:$8 sps:$4 sm:$0xff]  }
  0xa4   :  { %957 = vmatprep.subr.bf16.mxu0 %v2854_v43  ;;  %1258 = vmatpush1.bf16.msra.mxu1 %v2969_v41  ;;  %v2972_v43 = vld [vmem:[%s4150_s3 + $0xf0] ss:$8 sps:$4 sm:$0xff]   ;;  %v3074_v41 = vld [vmem:[%s4154_s11 + $0x28] sm:$0xff]  }
  0xa5   :  { %1259 = vmatprep.subr.bf16.mxu1 %v2970_v42  ;;  %v1057_v42 = vld [vmem:[%s4155_s4] sm:$0x3] }
  0xa7   :  { %958 = vmatpush1.bf16.msra.mxu0 %v2852_v45  ;;  %v179_v45 = vlaneseq }
  0xa8   :  { %959 = vmatprep.subr.bf16.mxu0 %v2857_v47  ;;  %1260 = vmatpush1.bf16.msra.mxu1 %v2972_v43 }
  0xa9   :  { %1478 = vmatprep.subr.bf16.mxu1 %v2975_v44  ;;  %v180_v46 = vshrl.u32 %v179_v45, 7 }
  0xab   :  { %960 = vmatpush1.bf16.msra.mxu0 %v2855_v49  ;;  %v3732_v47 = vsub.s32 0, %v180_v46  ;;  %v3737_v49 = vsub.s32 1, %v180_v46 }
  0xac   :  { %961 = vmatprep.subr.bf16.mxu0 %v2860_v51 }
  0xad   :  { %v182_v50 = vrot.slane %v177_v48, %v3732_v47  ;;  %v186_v51 = vrot.slane %v177_v48, %v3737_v49  ;;  %v1062_v43 = vrot.slane %v1057_v42, %v3732_v47  ;;  %v1066_v44 = vrot.slane %v1057_v42, %v3737_v49 }
  0xaf   :  { %962 = vmatpush1.bf16.msra.mxu0 %v2858_v53 }
  0xb0   :  { %963 = vmatprep.subr.bf16.mxu0 %v2863_v55 }
  0xb3   :  { %964 = vmatpush1.bf16.msra.mxu0 %v2861_v57 }
  0xb4   :  { %965 = vmatprep.subr.bf16.mxu0 %v2866_v59 }
  0xb7   :  { %966 = vmatpush1.bf16.msra.mxu0 %v2864_v61  ;;  %v2973_v61 = vld [vmem:[%s4151_s5] ss:$8 sps:$4 sm:$0xff]  }
  0xb8   :  { %967 = vmatprep.subr.bf16.mxu0 %v2869_v63  ;;  %v2978_v63 = vld [vmem:[%s4151_s5 + $0x14] ss:$8 sps:$4 sm:$0xff]  }
  0xbb   :  { %968 = vmatpush1.bf16.msra.mxu0 %v2867_v1  ;;  %v2981_v1 = vld [vmem:[%s4151_s5 + $0x24] ss:$8 sps:$4 sm:$0xff]  }
  0xbc   :  { %969 = vmatprep.subr.bf16.mxu0 %v2872_v2  ;;  %v2979_v2 = vld [vmem:[%s4151_s5 + $0x20] ss:$8 sps:$4 sm:$0xff]  }
  0xbf   :  { %970 = vmatpush1.bf16.msra.mxu0 %v2870_v3  ;;  %v2984_v3 = vld [vmem:[%s4151_s5 + $0x34] ss:$8 sps:$4 sm:$0xff]  }
  0xc0   :  { %980 = vmatprep.subr.bf16.mxu0 %v2877_v4  ;;  %v2982_v4 = vld [vmem:[%s4151_s5 + $0x30] ss:$8 sps:$4 sm:$0xff]  }
  0xc2   :  { %972 = vmatmul.mubr.bf16.vlgmr.msra.gmra.mrb[0].mxu0 %v2374_v7  ;;  %v2985_v7 = vld [vmem:[%s4151_s5 + $0x40] ss:$8 sps:$4 sm:$0xff]  }
  0xc3   :  { %981 = vmatpush1.bf16.msra.mxu0 %v2875_v8  ;;  %1012 = vmatprep.mubr.bf16.mxu0 %v2377_v9  ;;  %v2990_v8 = vld [vmem:[%s4151_s5 + $0x54] ss:$8 sps:$4 sm:$0xff]   ;;  %v2988_v9 = vld [vmem:[%s4151_s5 + $0x50] ss:$8 sps:$4 sm:$0xff]  }
  0xc4   :  { %982 = vmatprep.subr.bf16.mxu0 %v2880_v10  ;;  %v2993_v10 = vld [vmem:[%s4151_s5 + $0x64] ss:$8 sps:$4 sm:$0xff]  }
  0xc7   :  { %983 = vmatpush1.bf16.msra.mxu0 %v2878_v11  ;;  %v2991_v11 = vld [vmem:[%s4151_s5 + $0x60] ss:$8 sps:$4 sm:$0xff]  }
  0xc8   :  { %984 = vmatprep.subr.bf16.mxu0 %v2883_v6  ;;  %v2996_v6 = vld [vmem:[%s4151_s5 + $0x74] ss:$8 sps:$4 sm:$0xff]  }
  0xcb   :  { %985 = vmatpush1.bf16.msra.mxu0 %v2881_v12  ;;  %v2994_v12 = vld [vmem:[%s4151_s5 + $0x70] ss:$8 sps:$4 sm:$0xff]  }
  0xcc   :  { %986 = vmatprep.subr.bf16.mxu0 %v2886_v13  ;;  %v2999_v13 = vld [vmem:[%s4151_s5 + $0x84] ss:$8 sps:$4 sm:$0xff]  }
  0xcf   :  { %987 = vmatpush1.bf16.msra.mxu0 %v2884_v14  ;;  %v2997_v14 = vld [vmem:[%s4151_s5 + $0x80] ss:$8 sps:$4 sm:$0xff]  }
  0xd0   :  { %988 = vmatprep.subr.bf16.mxu0 %v2889_v15  ;;  %v3002_v15 = vld [vmem:[%s4151_s5 + $0x94] ss:$8 sps:$4 sm:$0xff]  }
  0xd3   :  { %989 = vmatpush1.bf16.msra.mxu0 %v2887_v16  ;;  %v3000_v16 = vld [vmem:[%s4151_s5 + $0x90] ss:$8 sps:$4 sm:$0xff]  }
  0xd4   :  { %990 = vmatprep.subr.bf16.mxu0 %v2892_v17  ;;  %v3005_v17 = vld [vmem:[%s4151_s5 + $0xa4] ss:$8 sps:$4 sm:$0xff]  }
  0xd7   :  { %991 = vmatpush1.bf16.msra.mxu0 %v2890_v18  ;;  %v3003_v18 = vld [vmem:[%s4151_s5 + $0xa0] ss:$8 sps:$4 sm:$0xff]  }
  0xd8   :  { %992 = vmatprep.subr.bf16.mxu0 %v2895_v19  ;;  %v3008_v19 = vld [vmem:[%s4151_s5 + $0xb4] ss:$8 sps:$4 sm:$0xff]  }
  0xdb   :  { %993 = vmatpush1.bf16.msra.mxu0 %v2893_v20  ;;  %v3006_v20 = vld [vmem:[%s4151_s5 + $0xb0] ss:$8 sps:$4 sm:$0xff]  }
  0xdc   :  { %994 = vmatprep.subr.bf16.mxu0 %v2898_v21  ;;  %v3011_v21 = vld [vmem:[%s4151_s5 + $0xc4] ss:$8 sps:$4 sm:$0xff]  }
  0xdf   :  { %995 = vmatpush1.bf16.msra.mxu0 %v2896_v22  ;;  %v3009_v22 = vld [vmem:[%s4151_s5 + $0xc0] ss:$8 sps:$4 sm:$0xff]  }
  0xe0   :  { %996 = vmatprep.subr.bf16.mxu0 %v2901_v23  ;;  %v3014_v23 = vld [vmem:[%s4151_s5 + $0xd4] ss:$8 sps:$4 sm:$0xff]  }
  0xe3   :  { %997 = vmatpush1.bf16.msra.mxu0 %v2899_v24  ;;  %v3012_v24 = vld [vmem:[%s4151_s5 + $0xd0] ss:$8 sps:$4 sm:$0xff]  }
  0xe4   :  { %998 = vmatprep.subr.bf16.mxu0 %v2904_v25  ;;  %v3017_v25 = vld [vmem:[%s4151_s5 + $0xe4] ss:$8 sps:$4 sm:$0xff]  }
  0xe7   :  { %999 = vmatpush1.bf16.msra.mxu0 %v2902_v26  ;;  %v3015_v26 = vld [vmem:[%s4151_s5 + $0xe0] ss:$8 sps:$4 sm:$0xff]  }
  0xe8   :  { %1000 = vmatprep.subr.bf16.mxu0 %v2907_v27  ;;  %v3020_v27 = vld [vmem:[%s4151_s5 + $0xf4] ss:$8 sps:$4 sm:$0xff]  }
  0xeb   :  { %1001 = vmatpush1.bf16.msra.mxu0 %v2905_v28  ;;  %v3018_v28 = vld [vmem:[%s4151_s5 + $0xf0] ss:$8 sps:$4 sm:$0xff]  }
  0xec   :  { %1002 = vmatprep.subr.bf16.mxu0 %v2910_v29  ;;  %v3023_v29 = vld [vmem:[%s4153_s7 + $0x4] ss:$8 sps:$4 sm:$0xff]  }
  0xef   :  { %1003 = vmatpush1.bf16.msra.mxu0 %v2908_v30  ;;  %v3048_v30 = vld [vmem:[%s4154_s11 + $0x40] sm:$0xff]  }
  0xf0   :  { %1004 = vmatprep.subr.bf16.mxu0 %v2913_v31  ;;  %v3049_v31 = vld [vmem:[%s4154_s11] sm:$0xff]  }
  0xf3   :  { %1005 = vmatpush1.bf16.msra.mxu0 %v2911_v32  ;;  %v3053_v32 = vld [vmem:[%s4154_s11 + $0x48] sm:$0xff]  }
  0xf4   :  { %1006 = vmatprep.subr.bf16.mxu0 %v2916_v33  ;;  %v3054_v33 = vld [vmem:[%s4154_s11 + $0x8] sm:$0xff]  }
  0xf7   :  { %1007 = vmatpush1.bf16.msra.mxu0 %v2914_v34  ;;  %v3058_v34 = vld [vmem:[%s4154_s11 + $0x50] sm:$0xff]  }
  0xf8   :  { %1008 = vmatprep.subr.bf16.mxu0 %v2919_v35  ;;  %v3059_v35 = vld [vmem:[%s4154_s11 + $0x10] sm:$0xff]  }
  0xfb   :  { %1009 = vmatpush1.bf16.msra.mxu0 %v2917_v36  ;;  %v3063_v36 = vld [vmem:[%s4154_s11 + $0x58] sm:$0xff]  }
  0xfc   :  { %1010 = vmatprep.subr.bf16.mxu0 %v2922_v37  ;;  %v3064_v37 = vld [vmem:[%s4154_s11 + $0x18] sm:$0xff]  }
  0xff   :  { %1011 = vmatpush1.bf16.msra.mxu0 %v2920_v38  ;;  %v3068_v38 = vld [vmem:[%s4154_s11 + $0x60] sm:$0xff]  }
 0x100   :  { %2667 = vmatprep.subr.bf16.mxu0 %v3048_v30 }
 0x102   :  { %1013 = vmatmul.mubr.bf16.vlgmr.msra.gmra.mrb[0].mxu0 %v2376_v39  ;;  %v3069_v39 = vld [vmem:[%s4154_s11 + $0x20] sm:$0xff]  }
 0x103   :  { %2668 = vmatpush3.bf16.msra.mxu0 %v3049_v31 }
 0x104   :  { %2669 = vmatprep.subr.bf16.mxu0 %v3053_v32 }
 0x107   :  { %2670 = vmatpush3.bf16.msra.mxu0 %v3054_v33 }
 0x108   :  { %2671 = vmatprep.subr.bf16.mxu0 %v3058_v34 }
 0x10b   :  { %2672 = vmatpush3.bf16.msra.mxu0 %v3059_v35 }
 0x10c   :  { %2673 = vmatprep.subr.bf16.mxu0 %v3063_v36 }
 0x10f   :  { %2674 = vmatpush3.bf16.msra.mxu0 %v3064_v37 }
 0x110   :  { %2675 = vmatprep.subr.bf16.mxu0 %v3068_v38 }
 0x113   :  { %2676 = vmatpush3.bf16.msra.mxu0 %v3069_v39 }
 0x114   :  { %2677 = vmatprep.subr.bf16.mxu0 %v3073_v40 }
 0x117   :  { %2678 = vmatpush3.bf16.msra.mxu0 %v3074_v41  ;;  %v3085_v41 = vld [vmem:[%s4156_s9] ss:$8 sps:$4 sm:$0xff]  }
 0x1d5   :  { %v1014_v52 = vpop.f32.mrb[0].mxu0 }
 0x1d6   :  { %v2711_v53 = vadd.f32 %v1014_v52, %v182_v50  ;;  %v1016_v54 = vpop.f32.mrb[1].mxu0 }
 0x1d7   :  { %v2712_v55 = vadd.f32 %v1016_v54, %v186_v51  ;;  %v1018_v56 = vpop.f32.mrb[2].mxu0 }
 0x1d8   :  { %v1021_v57 = vmax.f32 %v2711_v53, 0.0  ;;  %v1019_v58 = vpop.f32.mrb[3].mxu0  ;;  %v3021_v56 = vld [vmem:[%s4153_s7] ss:$8 sps:$4 sm:$0xff]  }
 0x1d9   :  { %v1022_v59 = vmax.f32 %v2712_v55, 0.0  ;;  %v3026_v58 = vld [vmem:[%s4153_s7 + $0x14] ss:$8 sps:$4 sm:$0xff]  }
 0x1da   :  { %v1023_v62 = vpack.c.bf16 %v1021_v57, %v1021_v57 }
 0x1db   :  { %v1024_v60 = vpack.c.bf16 %v1022_v59, %v1022_v59  ;;  %v3024_v59 = vld [vmem:[%s4153_s7 + $0x10] ss:$8 sps:$4 sm:$0xff]  }
 0x1dd   :  { %1261 = vmatprep.mubr.bf16.mxu1 %v1024_v60  ;;  %v3029_v60 = vld [vmem:[%s4153_s7 + $0x24] ss:$8 sps:$4 sm:$0xff]  }
 0x1de   :  { %1262 = vmatmul.mubr.bf16.vlgmr.msra.gmra.mrb[0].mxu1 %v1023_v62  ;;  %v3032_v62 = vld [vmem:[%s4153_s7 + $0x34] ss:$8 sps:$4 sm:$0xff]  }
 0x1df   :  { %1479 = vmatpush1.bf16.msra.mxu1 %v2973_v61  ;;  %v3027_v61 = vld [vmem:[%s4153_s7 + $0x20] ss:$8 sps:$4 sm:$0xff]  }
 0x1e0   :  { %1480 = vmatprep.subr.bf16.mxu1 %v2978_v63  ;;  %v3030_v63 = vld [vmem:[%s4153_s7 + $0x30] ss:$8 sps:$4 sm:$0xff]  }
 0x1e3   :  { %1481 = vmatpush1.bf16.msra.mxu1 %v2976_v0  ;;  %v3035_v0 = vld [vmem:[%s4153_s7 + $0x44] ss:$8 sps:$4 sm:$0xff]  }
 0x1e4   :  { %1482 = vmatprep.subr.bf16.mxu1 %v2981_v1  ;;  %v3033_v1 = vld [vmem:[%s4153_s7 + $0x40] ss:$8 sps:$4 sm:$0xff]  }
 0x1e7   :  { %1483 = vmatpush1.bf16.msra.mxu1 %v2979_v2  ;;  %v3038_v2 = vld [vmem:[%s4153_s7 + $0x54] ss:$8 sps:$4 sm:$0xff]  }
 0x1e8   :  { %1484 = vmatprep.subr.bf16.mxu1 %v2984_v3  ;;  %v3036_v3 = vld [vmem:[%s4153_s7 + $0x50] ss:$8 sps:$4 sm:$0xff]  }
 0x1eb   :  { %1485 = vmatpush1.bf16.msra.mxu1 %v2982_v4  ;;  %v3041_v4 = vld [vmem:[%s4153_s7 + $0x64] ss:$8 sps:$4 sm:$0xff]  }
 0x1ec   :  { %1486 = vmatprep.subr.bf16.mxu1 %v2987_v5  ;;  %v3039_v5 = vld [vmem:[%s4153_s7 + $0x60] ss:$8 sps:$4 sm:$0xff]  }
 0x1ef   :  { %1487 = vmatpush1.bf16.msra.mxu1 %v2985_v7  ;;  %v3044_v7 = vld [vmem:[%s4153_s7 + $0x74] ss:$8 sps:$4 sm:$0xff]  }
 0x1f0   :  { %1488 = vmatprep.subr.bf16.mxu1 %v2990_v8  ;;  %v3042_v8 = vld [vmem:[%s4153_s7 + $0x70] ss:$8 sps:$4 sm:$0xff]  }
 0x1f3   :  { %1489 = vmatpush1.bf16.msra.mxu1 %v2988_v9  ;;  %v3047_v9 = vld [vmem:[%s4153_s7 + $0x84] ss:$8 sps:$4 sm:$0xff]  }
 0x1f4   :  { %1490 = vmatprep.subr.bf16.mxu1 %v2993_v10  ;;  %v3045_v10 = vld [vmem:[%s4153_s7 + $0x80] ss:$8 sps:$4 sm:$0xff]  }
 0x1f7   :  { %1491 = vmatpush1.bf16.msra.mxu1 %v2991_v11  ;;  %v3052_v11 = vld [vmem:[%s4153_s7 + $0x94] ss:$8 sps:$4 sm:$0xff]  }
 0x1f8   :  { %1492 = vmatprep.subr.bf16.mxu1 %v2996_v6  ;;  %v3050_v6 = vld [vmem:[%s4153_s7 + $0x90] ss:$8 sps:$4 sm:$0xff]  }
 0x1fb   :  { %1493 = vmatpush1.bf16.msra.mxu1 %v2994_v12  ;;  %v3057_v12 = vld [vmem:[%s4153_s7 + $0xa4] ss:$8 sps:$4 sm:$0xff]  }
 0x1fc   :  { %1494 = vmatprep.subr.bf16.mxu1 %v2999_v13  ;;  %v3055_v13 = vld [vmem:[%s4153_s7 + $0xa0] ss:$8 sps:$4 sm:$0xff]  }
 0x1ff   :  { %1495 = vmatpush1.bf16.msra.mxu1 %v2997_v14  ;;  %v3062_v14 = vld [vmem:[%s4153_s7 + $0xb4] ss:$8 sps:$4 sm:$0xff]  }
 0x200   :  { %1496 = vmatprep.subr.bf16.mxu1 %v3002_v15  ;;  %v3060_v15 = vld [vmem:[%s4153_s7 + $0xb0] ss:$8 sps:$4 sm:$0xff]  }
 0x203   :  { %1497 = vmatpush1.bf16.msra.mxu1 %v3000_v16  ;;  %v3067_v16 = vld [vmem:[%s4153_s7 + $0xc4] ss:$8 sps:$4 sm:$0xff]  }
 0x204   :  { %1498 = vmatprep.subr.bf16.mxu1 %v3005_v17  ;;  %v3065_v17 = vld [vmem:[%s4153_s7 + $0xc0] ss:$8 sps:$4 sm:$0xff]  }
 0x207   :  { %1499 = vmatpush1.bf16.msra.mxu1 %v3003_v18  ;;  %v3072_v18 = vld [vmem:[%s4153_s7 + $0xd4] ss:$8 sps:$4 sm:$0xff]  }
 0x208   :  { %1500 = vmatprep.subr.bf16.mxu1 %v3008_v19  ;;  %v3070_v19 = vld [vmem:[%s4153_s7 + $0xd0] ss:$8 sps:$4 sm:$0xff]  }
 0x20b   :  { %1501 = vmatpush1.bf16.msra.mxu1 %v3006_v20  ;;  %v3077_v20 = vld [vmem:[%s4153_s7 + $0xe4] ss:$8 sps:$4 sm:$0xff]  }
 0x20c   :  { %1502 = vmatprep.subr.bf16.mxu1 %v3011_v21  ;;  %v3078_v21 = vld [vmem:[%s4154_s11 + $0x70] sm:$0xff]  }
 0x20d   :  { %2679 = vmatprep.subr.bf16.mxu0 %v3078_v21 }
 0x20f   :  { %1503 = vmatpush1.bf16.msra.mxu1 %v3009_v22  ;;  %v3075_v22 = vld [vmem:[%s4153_s7 + $0xe0] ss:$8 sps:$4 sm:$0xff]  }
 0x210   :  { %1504 = vmatprep.subr.bf16.mxu1 %v3014_v23  ;;  %v3079_v23 = vld [vmem:[%s4154_s11 + $0x30] sm:$0xff]  }
 0x211   :  { %2680 = vmatpush3.bf16.msra.mxu0 %v3079_v23 }
 0x213   :  { %1505 = vmatpush1.bf16.msra.mxu1 %v3012_v24  ;;  %v3082_v24 = vld [vmem:[%s4153_s7 + $0xf4] ss:$8 sps:$4 sm:$0xff]  }
 0x214   :  { %1506 = vmatprep.subr.bf16.mxu1 %v3017_v25  ;;  %v3083_v25 = vld [vmem:[%s4154_s11 + $0x78] sm:$0xff]  }
 0x215   :  { %2681 = vmatprep.subr.bf16.mxu0 %v3083_v25 }
 0x217   :  { %1507 = vmatpush1.bf16.msra.mxu1 %v3015_v26  ;;  %v3080_v26 = vld [vmem:[%s4153_s7 + $0xf0] ss:$8 sps:$4 sm:$0xff]  }
 0x218   :  { %1508 = vmatprep.subr.bf16.mxu1 %v3020_v27  ;;  %v3084_v27 = vld [vmem:[%s4154_s11 + $0x38] sm:$0xff]  }
 0x219   :  { %2682 = vmatpush3.bf16.msra.mxu0 %v3084_v27 }
 0x21b   :  { %1509 = vmatpush1.bf16.msra.mxu1 %v3018_v28  ;;  %v3087_v28 = vld [vmem:[%s4156_s9 + $0x4] ss:$8 sps:$4 sm:$0xff]  }
 0x21c   :  { %1727 = vmatprep.subr.bf16.mxu1 %v3023_v29  ;;  %v1306_v29 = vld [vmem:[%s4157_s6] sm:$0x3] }
 0x21d   :  { %v1311_v30 = vrot.slane %v1306_v29, %v3732_v47  ;;  %v1315_v31 = vrot.slane %v1306_v29, %v3737_v49  ;;  %v3134_v29 = vld [vmem:[%s4154_s11 + $0x80] sm:$0xff]  }
 0x2b1   :  { %v1263_v45 = vpop.f32.mrb[0].mxu1 }
 0x2b2   :  { %v1264_v46 = vadd.f32 %v1263_v45, %v1062_v43  ;;  %v1265_v48 = vpop.f32.mrb[1].mxu1  ;;  %v3090_v43 = vld [vmem:[%s4156_s9 + $0x14] ss:$8 sps:$4 sm:$0xff]   ;;  %v3093_v45 = vld [vmem:[%s4156_s9 + $0x24] ss:$8 sps:$4 sm:$0xff]  }
 0x2b3   :  { %v1266_v50 = vadd.f32 %v1265_v48, %v1066_v44  ;;  %v1267_v51 = vpop.f32.mrb[2].mxu1  ;;  %v3088_v44 = vld [vmem:[%s4156_s9 + $0x10] ss:$8 sps:$4 sm:$0xff]   ;;  %v3096_v48 = vld [vmem:[%s4156_s9 + $0x34] ss:$8 sps:$4 sm:$0xff]  }
 0x2b4   :  { %v1270_v52 = vmax.f32 %v1264_v46, 0.0  ;;  %v1268_v53 = vpop.f32.mrb[3].mxu1  ;;  %v3091_v46 = vld [vmem:[%s4156_s9 + $0x20] ss:$8 sps:$4 sm:$0xff]   ;;  %v3099_v51 = vld [vmem:[%s4156_s9 + $0x44] ss:$8 sps:$4 sm:$0xff]  }
 0x2b5   :  { %v1271_v54 = vmax.f32 %v1266_v50, 0.0  ;;  %v3094_v50 = vld [vmem:[%s4156_s9 + $0x30] ss:$8 sps:$4 sm:$0xff]   ;;  %v3102_v53 = vld [vmem:[%s4156_s9 + $0x54] ss:$8 sps:$4 sm:$0xff]  }
 0x2b6   :  { %v1272_v57 = vpack.c.bf16 %v1270_v52, %v1270_v52  ;;  %v3097_v52 = vld [vmem:[%s4156_s9 + $0x40] ss:$8 sps:$4 sm:$0xff]  }
 0x2b7   :  { %v1273_v55 = vpack.c.bf16 %v1271_v54, %v1271_v54  ;;  %v3100_v54 = vld [vmem:[%s4156_s9 + $0x50] ss:$8 sps:$4 sm:$0xff]  }
 0x2b9   :  { %1510 = vmatprep.mubr.bf16.mxu1 %v1273_v55  ;;  %v3105_v55 = vld [vmem:[%s4156_s9 + $0x64] ss:$8 sps:$4 sm:$0xff]  }
 0x2ba   :  { %1511 = vmatmul.mubr.bf16.vlgmr.msra.gmra.mrb[4].mxu1 %v1272_v57  ;;  %v3108_v57 = vld [vmem:[%s4156_s9 + $0x74] ss:$8 sps:$4 sm:$0xff]  }
 0x2bb   :  { %1728 = vmatpush1.bf16.msra.mxu1 %v3021_v56  ;;  %v3103_v56 = vld [vmem:[%s4156_s9 + $0x60] ss:$8 sps:$4 sm:$0xff]  }
 0x2bc   :  { %1729 = vmatprep.subr.bf16.mxu1 %v3026_v58  ;;  %v3106_v58 = vld [vmem:[%s4156_s9 + $0x70] ss:$8 sps:$4 sm:$0xff]  }
 0x2bf   :  { %1730 = vmatpush1.bf16.msra.mxu1 %v3024_v59  ;;  %v3111_v59 = vld [vmem:[%s4156_s9 + $0x84] ss:$8 sps:$4 sm:$0xff]  }
 0x2c0   :  { %1731 = vmatprep.subr.bf16.mxu1 %v3029_v60  ;;  %v3109_v60 = vld [vmem:[%s4156_s9 + $0x80] ss:$8 sps:$4 sm:$0xff]  }
 0x2c3   :  { %1732 = vmatpush1.bf16.msra.mxu1 %v3027_v61  ;;  %v3114_v61 = vld [vmem:[%s4156_s9 + $0x94] ss:$8 sps:$4 sm:$0xff]  }
 0x2c4   :  { %1733 = vmatprep.subr.bf16.mxu1 %v3032_v62  ;;  %v3112_v62 = vld [vmem:[%s4156_s9 + $0x90] ss:$8 sps:$4 sm:$0xff]  }
 0x2c7   :  { %1734 = vmatpush1.bf16.msra.mxu1 %v3030_v63  ;;  %v3117_v63 = vld [vmem:[%s4156_s9 + $0xa4] ss:$8 sps:$4 sm:$0xff]  }
 0x2c8   :  { %1735 = vmatprep.subr.bf16.mxu1 %v3035_v0  ;;  %v3115_v0 = vld [vmem:[%s4156_s9 + $0xa0] ss:$8 sps:$4 sm:$0xff]  }
 0x2cb   :  { %1736 = vmatpush1.bf16.msra.mxu1 %v3033_v1  ;;  %v3120_v1 = vld [vmem:[%s4156_s9 + $0xb4] ss:$8 sps:$4 sm:$0xff]  }
 0x2cc   :  { %1737 = vmatprep.subr.bf16.mxu1 %v3038_v2  ;;  %v3118_v2 = vld [vmem:[%s4156_s9 + $0xb0] ss:$8 sps:$4 sm:$0xff]  }
 0x2cf   :  { %1738 = vmatpush1.bf16.msra.mxu1 %v3036_v3  ;;  %v3123_v3 = vld [vmem:[%s4156_s9 + $0xc4] ss:$8 sps:$4 sm:$0xff]  }
 0x2d0   :  { %1739 = vmatprep.subr.bf16.mxu1 %v3041_v4  ;;  %v3121_v4 = vld [vmem:[%s4156_s9 + $0xc0] ss:$8 sps:$4 sm:$0xff]  }
 0x2d3   :  { %1740 = vmatpush1.bf16.msra.mxu1 %v3039_v5  ;;  %v3126_v5 = vld [vmem:[%s4156_s9 + $0xd4] ss:$8 sps:$4 sm:$0xff]  }
 0x2d4   :  { %1741 = vmatprep.subr.bf16.mxu1 %v3044_v7  ;;  %v3124_v7 = vld [vmem:[%s4156_s9 + $0xd0] ss:$8 sps:$4 sm:$0xff]  }
 0x2d7   :  { %1742 = vmatpush1.bf16.msra.mxu1 %v3042_v8  ;;  %v3129_v8 = vld [vmem:[%s4156_s9 + $0xe4] ss:$8 sps:$4 sm:$0xff]  }
 0x2d8   :  { %1743 = vmatprep.subr.bf16.mxu1 %v3047_v9  ;;  %v3127_v9 = vld [vmem:[%s4156_s9 + $0xe0] ss:$8 sps:$4 sm:$0xff]  }
 0x2db   :  { %1744 = vmatpush1.bf16.msra.mxu1 %v3045_v10  ;;  %v3132_v10 = vld [vmem:[%s4156_s9 + $0xf4] ss:$8 sps:$4 sm:$0xff]  }
 0x2dc   :  { %1745 = vmatprep.subr.bf16.mxu1 %v3052_v11  ;;  %v3130_v11 = vld [vmem:[%s4156_s9 + $0xf0] ss:$8 sps:$4 sm:$0xff]  }
 0x2df   :  { %1746 = vmatpush1.bf16.msra.mxu1 %v3050_v6  ;;  %v3133_v6 = vld [vmem:[%s4154_s11 + $0xc0] sm:$0xff]  }
 0x2e0   :  { %1747 = vmatprep.subr.bf16.mxu1 %v3057_v12  ;;  %v1555_v12 = vld [vmem:[%s4158_s8] sm:$0x3] }
 0x2e3   :  { %1748 = vmatpush1.bf16.msra.mxu1 %v3055_v13  ;;  %v1560_v13 = vrot.slane %v1555_v12, %v3732_v47 }
 0x2e4   :  { %1749 = vmatprep.subr.bf16.mxu1 %v3062_v14  ;;  %v1564_v14 = vrot.slane %v1555_v12, %v3737_v49 }
 0x2e7   :  { %1750 = vmatpush1.bf16.msra.mxu1 %v3060_v15 }
 0x2e8   :  { %1751 = vmatprep.subr.bf16.mxu1 %v3067_v16 }
 0x2eb   :  { %1752 = vmatpush1.bf16.msra.mxu1 %v3065_v17 }
 0x2ec   :  { %1753 = vmatprep.subr.bf16.mxu1 %v3072_v18 }
 0x2ef   :  { %1754 = vmatpush1.bf16.msra.mxu1 %v3070_v19 }
 0x2f0   :  { %1755 = vmatprep.subr.bf16.mxu1 %v3077_v20 }
 0x2f3   :  { %1756 = vmatpush1.bf16.msra.mxu1 %v3075_v22 }
 0x2f4   :  { %1757 = vmatprep.subr.bf16.mxu1 %v3082_v24 }
 0x2f7   :  { %1758 = vmatpush1.bf16.msra.mxu1 %v3080_v26 }
 0x2f8   :  { %1976 = vmatprep.subr.bf16.mxu1 %v3087_v28 }
 0x38d   :  { %v1512_v32 = vpop.f32.mrb[4].mxu1 }
 0x38e   :  { %v1513_v33 = vadd.f32 %v1512_v32, %v1311_v30  ;;  %v1514_v34 = vpop.f32.mrb[5].mxu1  ;;  %v3136_v32 = vld [vmem:[%s4154_s11 + $0x88] sm:$0xff]  }
 0x38f   :  { %v1515_v35 = vadd.f32 %v1514_v34, %v1315_v31  ;;  %v1516_v36 = vpop.f32.mrb[6].mxu1  ;;  %v3135_v31 = vld [vmem:[%s4154_s11 + $0xc8] sm:$0xff]   ;;  %v3138_v34 = vld [vmem:[%s4154_s11 + $0x90] sm:$0xff]  }
 0x390   :  { %v1519_v37 = vmax.f32 %v1513_v33, 0.0  ;;  %v1517_v38 = vpop.f32.mrb[7].mxu1  ;;  %v3137_v33 = vld [vmem:[%s4154_s11 + $0xd0] sm:$0xff]   ;;  %v3140_v36 = vld [vmem:[%s4154_s11 + $0x98] sm:$0xff]  }
 0x391   :  { %v1520_v39 = vmax.f32 %v1515_v35, 0.0  ;;  %v3139_v35 = vld [vmem:[%s4154_s11 + $0xd8] sm:$0xff]   ;;  %v3142_v38 = vld [vmem:[%s4154_s11 + $0xa0] sm:$0xff]  }
 0x392   :  { %v1521_v42 = vpack.c.bf16 %v1519_v37, %v1519_v37  ;;  %v3141_v37 = vld [vmem:[%s4154_s11 + $0xe0] sm:$0xff]  }
 0x393   :  { %v1522_v40 = vpack.c.bf16 %v1520_v39, %v1520_v39  ;;  %v3143_v39 = vld [vmem:[%s4154_s11 + $0xe8] sm:$0xff]  }
 0x395   :  { %1759 = vmatprep.mubr.bf16.mxu1 %v1522_v40  ;;  %2316 = vmatprep.mubr.bf16.mxu0 %v1522_v40  ;;  %v3144_v40 = vld [vmem:[%s4154_s11 + $0xa8] sm:$0xff]  }
 0x396   :  { %1760 = vmatmul.mubr.bf16.vlgmr.msra.gmra.mrb[8].mxu1 %v1521_v42  ;;  %2317 = vmatmul.mubr.bf16.vlgmr.msra.gmra.mrb[4].mxu0 %v1521_v42  ;;  %v3146_v42 = vld [vmem:[%s4154_s11 + $0xb0] sm:$0xff]  }
 0x397   :  { %1977 = vmatpush1.bf16.msra.mxu1 %v3085_v41  ;;  %v3145_v41 = vld [vmem:[%s4154_s11 + $0xf0] sm:$0xff]  }
 0x398   :  { %1978 = vmatprep.subr.bf16.mxu1 %v3090_v43  ;;  %v3147_v43 = vld [vmem:[%s4154_s11 + $0xf8] sm:$0xff]  }
 0x39b   :  { %1979 = vmatpush1.bf16.msra.mxu1 %v3088_v44  ;;  %v3148_v44 = vld [vmem:[%s4154_s11 + $0xb8] sm:$0xff]  }
 0x39c   :  { %1980 = vmatprep.subr.bf16.mxu1 %v3093_v45  ;;  %v1804_v45 = vld [vmem:[%s4159_s10] sm:$0x3] }
 0x39f   :  { %1981 = vmatpush1.bf16.msra.mxu1 %v3091_v46  ;;  %v1809_v46 = vrot.slane %v1804_v45, %v3732_v47 }
 0x3a0   :  { %1982 = vmatprep.subr.bf16.mxu1 %v3096_v48  ;;  %v1813_v48 = vrot.slane %v1804_v45, %v3737_v49 }
 0x3a3   :  { %1983 = vmatpush1.bf16.msra.mxu1 %v3094_v50 }
 0x3a4   :  { %1984 = vmatprep.subr.bf16.mxu1 %v3099_v51 }
 0x3a7   :  { %1985 = vmatpush1.bf16.msra.mxu1 %v3097_v52 }
 0x3a8   :  { %1986 = vmatprep.subr.bf16.mxu1 %v3102_v53 }
 0x3ab   :  { %1987 = vmatpush1.bf16.msra.mxu1 %v3100_v54 }
 0x3ac   :  { %1988 = vmatprep.subr.bf16.mxu1 %v3105_v55 }
 0x3af   :  { %1989 = vmatpush1.bf16.msra.mxu1 %v3103_v56 }
 0x3b0   :  { %1990 = vmatprep.subr.bf16.mxu1 %v3108_v57 }
 0x3b3   :  { %1991 = vmatpush1.bf16.msra.mxu1 %v3106_v58 }
 0x3b4   :  { %1992 = vmatprep.subr.bf16.mxu1 %v3111_v59 }
 0x3b7   :  { %1993 = vmatpush1.bf16.msra.mxu1 %v3109_v60  ;;  %v2634_v60 = vld [vmem:[%s4160_s12] ss:$0 sm:$0xff] }
 0x3b8   :  { %1994 = vmatprep.subr.bf16.mxu1 %v3114_v61 }
 0x3bb   :  { %1995 = vmatpush1.bf16.msra.mxu1 %v3112_v62 }
 0x3bc   :  { %1996 = vmatprep.subr.bf16.mxu1 %v3117_v63 }
 0x3bf   :  { %1997 = vmatpush1.bf16.msra.mxu1 %v3115_v0 }
 0x3c0   :  { %1998 = vmatprep.subr.bf16.mxu1 %v3120_v1 }
 0x3c3   :  { %1999 = vmatpush1.bf16.msra.mxu1 %v3118_v2 }
 0x3c4   :  { %2000 = vmatprep.subr.bf16.mxu1 %v3123_v3 }
 0x3c7   :  { %2001 = vmatpush1.bf16.msra.mxu1 %v3121_v4 }
 0x3c8   :  { %2002 = vmatprep.subr.bf16.mxu1 %v3126_v5 }
 0x3cb   :  { %2003 = vmatpush1.bf16.msra.mxu1 %v3124_v7 }
 0x3cc   :  { %2004 = vmatprep.subr.bf16.mxu1 %v3129_v8 }
 0x3cf   :  { %2005 = vmatpush1.bf16.msra.mxu1 %v3127_v9 }
 0x3d0   :  { %2006 = vmatprep.subr.bf16.mxu1 %v3132_v10 }
 0x3d3   :  { %2007 = vmatpush1.bf16.msra.mxu1 %v3130_v11 }
 0x3d4   :  { %2689 = vmatprep.subr.bf16.mxu1 %v3133_v6 }
 0x469   :  { %v1761_v15 = vpop.f32.mrb[8].mxu1  ;;  %v2683_v16 = vpop.f32.mrb[4].mxu0 }
 0x46a   :  { %v1762_v17 = vadd.f32 %v1761_v15, %v1560_v13  ;;  %v1763_v18 = vpop.f32.mrb[9].mxu1  ;;  %v2684_v19 = vpop.f32.mrb[5].mxu0 }
 0x46b   :  { %v1764_v20 = vadd.f32 %v1763_v18, %v1564_v14  ;;  %v2685_v21 = vadd.f32 %v2684_v19, %v2683_v16  ;;  %v1765_v22 = vpop.f32.mrb[10].mxu1  ;;  %v2686_v23 = vpop.f32.mrb[6].mxu0 }
 0x46c   :  { %v1768_v24 = vmax.f32 %v1762_v17, 0.0  ;;  %v1766_v25 = vpop.f32.mrb[11].mxu1  ;;  %v2687_v26 = vpop.f32.mrb[7].mxu0 }
 0x46d   :  { %v1769_v27 = vmax.f32 %v1764_v20, 0.0  ;;  %v2319_v62 = vadd.f32 %v2685_v21, %v2634_v60 }
 0x46e   :  { %v1770_v30 = vpack.c.bf16 %v1768_v24, %v1768_v24 }
 0x46f   :  { %v1771_v28 = vpack.c.bf16 %v1769_v27, %v1769_v27 }
 0x471   :  { %2008 = vmatprep.mubr.bf16.mxu1 %v1771_v28 }
 0x472   :  { %2009 = vmatmul.mubr.bf16.vlgmr.msra.gmra.mrb[12].mxu1 %v1770_v30 }
 0x473   :  { %2690 = vmatpush3.bf16.msra.mxu1 %v3134_v29 }
 0x474   :  { %2691 = vmatprep.subr.bf16.mxu1 %v3135_v31 }
 0x477   :  { %2692 = vmatpush3.bf16.msra.mxu1 %v3136_v32 }
 0x478   :  { %2693 = vmatprep.subr.bf16.mxu1 %v3137_v33 }
 0x47b   :  { %2694 = vmatpush3.bf16.msra.mxu1 %v3138_v34 }
 0x47c   :  { %2695 = vmatprep.subr.bf16.mxu1 %v3139_v35 }
 0x47f   :  { %2696 = vmatpush3.bf16.msra.mxu1 %v3140_v36 }
 0x480   :  { %2697 = vmatprep.subr.bf16.mxu1 %v3141_v37 }
 0x483   :  { %2698 = vmatpush3.bf16.msra.mxu1 %v3142_v38 }
 0x484   :  { %2699 = vmatprep.subr.bf16.mxu1 %v3143_v39 }
 0x487   :  { %2700 = vmatpush3.bf16.msra.mxu1 %v3144_v40 }
 0x488   :  { %2701 = vmatprep.subr.bf16.mxu1 %v3145_v41 }
 0x48b   :  { %2702 = vmatpush3.bf16.msra.mxu1 %v3146_v42 }
 0x48c   :  { %2703 = vmatprep.subr.bf16.mxu1 %v3147_v43 }
 0x48f   :  { %2704 = vmatpush3.bf16.msra.mxu1 %v3148_v44 }
 0x545   :  { %v2010_v50 = vpop.f32.mrb[12].mxu1 }
 0x546   :  { %v2011_v51 = vadd.f32 %v2010_v50, %v1809_v46  ;;  %v2012_v52 = vpop.f32.mrb[13].mxu1 }
 0x547   :  { %v2013_v53 = vadd.f32 %v2012_v52, %v1813_v48  ;;  %v2014_v54 = vpop.f32.mrb[14].mxu1 }
 0x548   :  { %v2017_v55 = vmax.f32 %v2011_v51, 0.0  ;;  %v2015_v56 = vpop.f32.mrb[15].mxu1 }
 0x549   :  { %v2018_v57 = vmax.f32 %v2013_v53, 0.0 }
 0x54a   :  { %v2019_v59 = vpack.c.bf16 %v2017_v55, %v2017_v55 }
 0x54b   :  { %v2020_v58 = vpack.c.bf16 %v2018_v57, %v2018_v57 }
 0x54d   :  { %2356 = vmatprep.mubr.bf16.mxu1 %v2020_v58 }
 0x54e   :  { %2357 = vmatmul.mubr.bf16.vlgmr.msra.gmra.mrb[16].mxu1 %v2019_v59 }
 0x621   :  { %v2705_v61 = vpop.f32.mrb[16].mxu1 }
 0x622   :  { %v2706_v47 = vpop.f32.mrb[17].mxu1 }
 0x623   :  { %v2707_v49 = vadd.f32 %v2706_v47, %v2705_v61  ;;  %v2708_v63 = vpop.f32.mrb[18].mxu1 }
 0x624   :  { %v2709_v0 = vpop.f32.mrb[19].mxu1 }
 0x625   :  { %v2359_v1 = vadd.f32 %v2707_v49, %v2319_v62 }
 0x627   :  { %v2364_v2 = vpack.c.bf16 %v2359_v1, %v2359_v1 }
 0x629   :  { %2365 = vst [vmem:[%s4161_s13] sm:$0xf] %v2364_v2 }

</bundles_post_ra>
